<compile_context>
chip_gen: v7x
topology: tpu7x:2x2x1
jax: 0.10.0
libtpu: 0.0.40
codegen_flags: <defaults>
</compile_context>

<pallas_src>
import math
import numpy as np
import jax
import jax.numpy as jnp
from jax.experimental import pallas as pl

# ---------------- configuration (small shapes) ----------------
BATCH = 2
SEQ = 8
DIM = 32
DEPTH = 2
HEADS = 4
DIM_HEAD = 8
DIM_COND = DIM * 4
FF_INNER = int(DIM * 4 * 2 / 3)          # 85
FF_PAD = 128                             # GEGLU inner dim padded to lane-dense 128
QKVG_WIDTH = 3 * DIM + HEADS             # 100 (Q|K|V|gates)
QKVG_PAD = 128                           # padded to lane-dense 128
SOFTCAP = 50.0
SCALE = DIM_HEAD ** -0.5
LN_EPS = 1e-5
BN = BATCH * SEQ

# ---- static row layout of the two constant weight slabs (one DMA each) ----
# w128 slab (lane width 128): per-layer block of W128_ROWS rows
R_QKVG = 0                       # [DIM, 128]   fused Q|K|V|gates projection
R_W1V = DIM                      # [DIM, 128]   GEGLU value half (padded 85->128)
R_W1G = 2 * DIM                  # [DIM, 128]   GEGLU gate half
R_B1V = 3 * DIM                  # [1, 128]     value bias
R_B1G = 3 * DIM + 8              # [1, 128]     gate bias (8-row aligned)
W128_ROWS = 3 * DIM + 16         # 112 rows per layer
# w32 slab (lane width DIM): per-layer block of W32_ROWS rows, RMS gamma at the end
R_WO = 0                         # [DIM, DIM]   per-head output proj, head-major rows
R_W2 = DIM                       # [FF_PAD, DIM]
R_B2 = DIM + FF_PAD              # [1, DIM]
R_SKIP = DIM + FF_PAD + 8        # [2*DIM, DIM] unet skip proj (zeros if absent)
W32_ROWS = 3 * DIM + FF_PAD + 8  # 232 rows per layer
R_RMS = DEPTH * W32_ROWS         # [1, DIM]     final RMSNorm gamma


# ---------------- in-kernel helpers ----------------
def _gelu_tanh(x):
    # tanh-form GELU: runs on the EUP slot; |err| vs exact erf GELU ~3e-4,
    # well inside the validation tolerance (documented intentional approx).
    c = 0.7978845608028654  # sqrt(2/pi)
    return 0.5 * x * (1.0 + jnp.tanh(c * (x + 0.044715 * x * x * x)))


def _layernorm(x):
    # var = E[x^2] - mu^2: the two cross-lane reduces are independent (issue
    # back-to-back on the XLU) instead of the serial mean->centered-var chain.
    mu = jnp.mean(x, axis=-1, keepdims=True)
    ms = jnp.mean(x * x, axis=-1, keepdims=True)
    return (x - mu) * jax.lax.rsqrt(ms - mu * mu + LN_EPS)


# ---------------- fused whole-network kernel ----------------
def fused_transformer_kernel(x_ref, cpk_ref, w128_ref, w32_ref, out_ref):
    x = x_ref[...]                               # [BN, DIM], VMEM-resident throughout

    # Block-diagonal causal keep mask (same batch AND key<=query), built once
    # in-kernel from 2-D iotas: no O((b*n)^2) bias operand / DMA, reused by all
    # heads and layers.  Applied multiplicatively after exp().
    row = jax.lax.broadcasted_iota(jnp.int32, (BN, BN), 0)
    col = jax.lax.broadcasted_iota(jnp.int32, (BN, BN), 1)
    if SEQ & (SEQ - 1) == 0:                     # power-of-two: shift, no vector div
        shift = SEQ.bit_length() - 1
        same_batch = (row >> shift) == (col >> shift)
    else:
        same_batch = (row // SEQ) == (col // SEQ)
    keep = jnp.where(same_batch & (col <= row), 1.0, 0.0)

    skips = []
    for l in range(DEPTH):                       # unrolled at trace time (DEPTH == 2)
        r128 = l * W128_ROWS
        r32 = l * W32_ROWS
        layer = l + 1
        if layer <= DEPTH // 2:
            skips.append(x)
        elif l >= DEPTH / 2:                     # latter half: U-Net skip proj + residual
            skip = skips.pop()
            sw = w32_ref[r32 + R_SKIP:r32 + R_SKIP + 2 * DIM, :]       # [2*DIM, DIM]
            x = x + (jnp.dot(x, sw[:DIM, :], preferred_element_type=jnp.float32)
                     + jnp.dot(skip, sw[DIM:, :], preferred_element_type=jnp.float32))

        # ---------------- attention sublayer ----------------
        s = (2 * l) * 3                          # scale_pre | shift_pre | scale_post
        xin = _layernorm(x) * cpk_ref[s] + cpk_ref[s + 1]

        # fused Q|K|V|gates projection: one [BN,32] x [32,128] matmul
        qkvg = jnp.dot(xin, w128_ref[r128 + R_QKVG:r128 + R_QKVG + DIM, :],
                       preferred_element_type=jnp.float32)             # [BN, 128]
        gates = jax.nn.sigmoid(qkvg[:, 3 * DIM:3 * DIM + HEADS])        # [BN, H]
        wo = w32_ref[r32 + R_WO:r32 + R_WO + DIM, :]                    # [DIM, DIM]

        attn_out = jnp.zeros((BN, DIM), jnp.float32)
        for h in range(HEADS):
            qh = qkvg[:, h * DIM_HEAD:(h + 1) * DIM_HEAD] * SCALE
            kh = qkvg[:, DIM + h * DIM_HEAD:DIM + (h + 1) * DIM_HEAD]
            vh = qkvg[:, 2 * DIM + h * DIM_HEAD:2 * DIM + (h + 1) * DIM_HEAD]
            sim = jax.lax.dot_general(qh, kh, (((1,), (1,)), ((), ())),
                                      preferred_element_type=jnp.float32)   # [BN, BN]
            sim = jnp.tanh(sim * (1.0 / SOFTCAP)) * SOFTCAP
            # no row-max: |sim| <= 50 post-softcap so exp() is in f32 range;
            # masked entries are zeroed multiplicatively (no -inf / NaN risk).
            p = jnp.exp(sim) * keep
            p = p * pl.reciprocal(jnp.sum(p, axis=-1, keepdims=True), approx=True)
            oh = jnp.dot(p, vh, preferred_element_type=jnp.float32)         # [BN, DH]
            # fold gate + this head's slice of the output projection and
            # accumulate: replaces the cross-lane heads concat with MXU slack.
            attn_out = attn_out + jnp.dot(
                oh * gates[:, h:h + 1],
                wo[h * DIM_HEAD:(h + 1) * DIM_HEAD, :],
                preferred_element_type=jnp.float32)
        x = x + attn_out * cpk_ref[s + 2]

        # ---------------- feedforward (GEGLU) sublayer ----------------
        s = (2 * l + 1) * 3
        xin = _layernorm(x) * cpk_ref[s] + cpk_ref[s + 1]
        h_val = (jnp.dot(xin, w128_ref[r128 + R_W1V:r128 + R_W1V + DIM, :],
                         preferred_element_type=jnp.float32)
                 + w128_ref[r128 + R_B1V:r128 + R_B1V + 1, :])
        h_gate = (jnp.dot(xin, w128_ref[r128 + R_W1G:r128 + R_W1G + DIM, :],
                          preferred_element_type=jnp.float32)
                  + w128_ref[r128 + R_B1G:r128 + R_B1G + 1, :])
        act = _gelu_tanh(h_gate) * h_val                                  # [BN, 128]
        ff_out = (jnp.dot(act, w32_ref[r32 + R_W2:r32 + R_W2 + FF_PAD, :],
                          preferred_element_type=jnp.float32)
                  + w32_ref[r32 + R_B2:r32 + R_B2 + 1, :])
        x = x + ff_out * cpk_ref[s + 2]

    # ---------------- final RMSNorm ----------------
    rmsg = w32_ref[R_RMS:R_RMS + 1, :]
    ss = jnp.sum(x * x, axis=-1, keepdims=True)
    xn = x * jax.lax.rsqrt(jnp.maximum(ss, 1e-24))      # == x / max(||x||, 1e-12)
    out_ref[...] = xn * (DIM ** 0.5) * (rmsg + 1.0)


# ---------------- one-time weight packing (NOT in the per-call path) ----------------
def pack_weights(params):
    """Pack all static per-layer weights into two contiguous slabs plus stacked
    conditioning-projection weights.  Call once at init; only the conditioning
    pack and x are recomputed per forward call."""
    d = DIM
    pad_i = FF_PAD - FF_INNER
    w128_blocks, w32_blocks = [], []
    film_w, film_b, ada_w, ada_b, lng, lsc = [], [], [], [], [], []

    for lyr in params['layers']:
        for prefix in ('attn', 'ff'):
            film_w.append(lyr[f'{prefix}_film_w'])
            film_b.append(lyr[f'{prefix}_film_b'])
            ada_w.append(lyr[f'{prefix}_ada_w'])
            ada_b.append(lyr[f'{prefix}_ada_b'])
            lng.append(lyr[f'{prefix}_lng'][0])
            lsc.append(lyr[f'{prefix}_lscale'][0])

        # fused, lane-padded Q|K|V|gates projection (heads folded into one matmul)
        wq = jnp.transpose(lyr['w_q'], (1, 0, 2)).reshape(d, HEADS * DIM_HEAD)
        wk = jnp.transpose(lyr['w_k'], (1, 0, 2)).reshape(d, HEADS * DIM_HEAD)
        wv = jnp.transpose(lyr['w_v'], (1, 0, 2)).reshape(d, HEADS * DIM_HEAD)
        wg = jnp.transpose(lyr['w_g'], (1, 0, 2)).reshape(d, HEADS)
        wqkvg = jnp.pad(jnp.concatenate([wq, wk, wv, wg], axis=-1),
                        ((0, 0), (0, QKVG_PAD - QKVG_WIDTH)))

        blk128 = jnp.zeros((W128_ROWS, 128), jnp.float32)
        blk128 = blk128.at[R_QKVG:R_QKVG + d].set(wqkvg)
        blk128 = blk128.at[R_W1V:R_W1V + d].set(jnp.pad(lyr['ff_w1a'], ((0, 0), (0, pad_i))))
        blk128 = blk128.at[R_W1G:R_W1G + d].set(jnp.pad(lyr['ff_w1b'], ((0, 0), (0, pad_i))))
        blk128 = blk128.at[R_B1V:R_B1V + 1].set(jnp.pad(lyr['ff_b1a'], ((0, 0), (0, pad_i))))
        blk128 = blk128.at[R_B1G:R_B1G + 1].set(jnp.pad(lyr['ff_b1b'], ((0, 0), (0, pad_i))))
        w128_blocks.append(blk128)

        blk32 = jnp.zeros((W32_ROWS, d), jnp.float32)
        blk32 = blk32.at[R_WO:R_WO + d].set(lyr['w_o'].reshape(HEADS * DIM_HEAD, d))
        blk32 = blk32.at[R_W2:R_W2 + FF_PAD].set(jnp.pad(lyr['ff_w2'], ((0, pad_i), (0, 0))))
        blk32 = blk32.at[R_B2:R_B2 + 1].set(lyr['ff_b2'])
        if 'skip_wa' in lyr:
            blk32 = blk32.at[R_SKIP:R_SKIP + 2 * d].set(
                jnp.concatenate([lyr['skip_wa'], lyr['skip_wb']], axis=0))
        w32_blocks.append(blk32)

    rms_blk = jnp.zeros((8, d), jnp.float32).at[0:1].set(params['rms_gamma'])
    packed = {
        'fourier_w': params['fourier_w'],
        'time_w': params['time_w'],
        'time_b': params['time_b'],
        'film_w': jnp.stack(film_w),                       # [2*DEPTH, 4d, 2d]
        'film_b': jnp.stack(film_b),                       # [2*DEPTH, 2d]
        'ada_w': jnp.stack(ada_w),                         # [2*DEPTH, 4d, d]
        'ada_b': jnp.stack(ada_b),                         # [2*DEPTH, d]
        'lng': jnp.stack(lng)[:, None, None, :],           # [2*DEPTH, 1, 1, d]
        'lscale': jnp.stack(lsc)[:, None, None, :],        # [2*DEPTH, 1, 1, d]
        'w128': jnp.concatenate(w128_blocks, axis=0),      # [DEPTH*112, 128]
        'w32': jnp.concatenate(w32_blocks + [rms_blk], axis=0),  # [DEPTH*232+8, 32]
    }
    return jax.tree_util.tree_map(jnp.asarray, packed)


# ---------------- plain-JAX per-call glue (conditioning only) ----------------
def time_cond(p, times):
    # RandomFourierEmbed -> Linear(dim+1, 4*dim) -> SiLU
    t = times[:, None]                                           # [b, 1]
    freqs = t[..., None] * p['fourier_w'] * 2.0 * jnp.pi         # [b, 1, dim//2]
    emb = jnp.concatenate([t[..., None], jnp.sin(freqs), jnp.cos(freqs)], axis=-1)
    cond = emb @ p['time_w'] + p['time_b']                       # [b, 1, 4*dim]
    return jax.nn.silu(cond)


@jax.jit
def transformer_forward(packed, x, times, is_any_modality):
    b, n, d = x.shape
    cond = time_cond(packed, times)[:, 0, :]                     # [b, 4*dim]
    mask = is_any_modality[None, :, :, None]                     # [1, b, n, 1] bool

    # Per-sublayer conditioning for ALL 2*DEPTH sublayers in two batched einsums
    # (FiLM gamma/beta + ada-LN-zero), then fold the text/modality select,
    # layernorm_gamma, layerscale and sigmoid into (scale_pre, shift_pre,
    # scale_post) -> [2*DEPTH*3, BN, DIM] for leading-axis indexing in-kernel.
    film = jnp.einsum('bd,lde->lbe', cond, packed['film_w']) + packed['film_b'][:, None, :]
    gamma = film[:, :, None, :DIM]                               # [L2, b, 1, d]
    beta = film[:, :, None, DIM:]
    ada = (jnp.einsum('bd,lde->lbe', cond, packed['ada_w'])
           + packed['ada_b'][:, None, :])[:, :, None, :]

    scale_pre = jnp.where(mask, gamma + 1.0, packed['lng'] + 1.0)        # [L2, b, n, d]
    shift_pre = jnp.where(mask, beta, 0.0)
    scale_post = jnp.where(mask, jax.nn.sigmoid(ada), packed['lscale'] + 1.0)
    cond_pack = jnp.stack([scale_pre, shift_pre, scale_post], axis=1)    # [L2, 3, b, n, d]
    cond_pack = cond_pack.reshape(DEPTH * 2 * 3, BN, DIM)

    out_flat = pl.pallas_call(
        fused_transformer_kernel,
        out_shape=jax.ShapeDtypeStruct((BN, DIM), jnp.float32),
    )(x.reshape(BN, DIM), cond_pack, packed['w128'], packed['w32'])
    return out_flat.reshape(b, n, d)


# ---------------- pure-JAX reference (for validation) ----------------
def adaptive_inputs(cond, film_w, film_b, ada_w, ada_b):
    film = cond @ film_w + film_b                                # [b, 1, 2*dim]
    gamma, beta = film[..., :DIM], film[..., DIM:]
    ada = cond @ ada_w + ada_b                                   # [b, 1, dim]
    return gamma, beta, ada


def reference_forward(params, x, times, is_any_modality):
    cond = time_cond(params, times)
    mask = is_any_modality[..., None]

    def pre(x, gamma, beta, lng):
        mu = jnp.mean(x, -1, keepdims=True)
        var = jnp.mean((x - mu) ** 2, -1, keepdims=True)
        xn = (x - mu) / jnp.sqrt(var + LN_EPS)
        return jnp.where(mask, xn * (gamma + 1.0) + beta, xn * (lng + 1.0))

    def post(o, lscale, ada):
        return jnp.where(mask, o * jax.nn.sigmoid(ada), o * (lscale + 1.0))

    skips = []
    n = x.shape[1]
    causal = jnp.tril(jnp.ones((n, n), bool))
    for ind, lyr in enumerate(params['layers']):
        layer = ind + 1
        if layer <= DEPTH // 2:
            skips.append(x)
        elif 'skip_wa' in lyr:
            skip = skips.pop()
            x = x @ lyr['skip_wa'] + skip @ lyr['skip_wb'] + x

        gamma, beta, ada = adaptive_inputs(cond, lyr['attn_film_w'], lyr['attn_film_b'],
                                           lyr['attn_ada_w'], lyr['attn_ada_b'])
        xin = pre(x, gamma, beta, lyr['attn_lng'])
        q = jnp.einsum('bnd,hdf->bhnf', xin, lyr['w_q']) * SCALE
        k = jnp.einsum('bnd,hdf->bhnf', xin, lyr['w_k'])
        v = jnp.einsum('bnd,hdf->bhnf', xin, lyr['w_v'])
        sim = jnp.einsum('bhif,bhjf->bhij', q, k)
        sim = jnp.tanh(sim / SOFTCAP) * SOFTCAP
        sim = jnp.where(causal, sim, -jnp.finfo(jnp.float32).max)
        attn = jax.nn.softmax(sim, axis=-1)
        o = jnp.einsum('bhij,bhjf->bhif', attn, v)
        gates = jax.nn.sigmoid(jnp.einsum('bnd,hdo->bhno', xin, lyr['w_g']))
        o = jnp.einsum('bhnf,hfd->bnd', o * gates, lyr['w_o'])
        x = post(o, lyr['attn_lscale'], ada) + x

        gamma, beta, ada = adaptive_inputs(cond, lyr['ff_film_w'], lyr['ff_film_b'],
                                           lyr['ff_ada_w'], lyr['ff_ada_b'])
        xin = pre(x, gamma, beta, lyr['ff_lng'])
        hx = xin @ lyr['ff_w1a'] + lyr['ff_b1a']
        hg = xin @ lyr['ff_w1b'] + lyr['ff_b1b']
        o = (jax.nn.gelu(hg, approximate=False) * hx) @ lyr['ff_w2'] + lyr['ff_b2']
        x = post(o, lyr['ff_lscale'], ada) + x

    norm = jnp.linalg.norm(x, axis=-1, keepdims=True)
    xn = x / jnp.maximum(norm, 1e-12)
    return xn * (DIM ** 0.5) * (params['rms_gamma'] + 1.0)


# ---------------- deterministic synthetic parameters ----------------
def init_params(key):
    keys = iter(jax.random.split(key, 128))

    def nrm(shape, scale):
        return jax.random.normal(next(keys), shape, jnp.float32) * scale

    params = {
        'fourier_w': nrm((DIM // 2,), 1.0),            # RandomFourierEmbed buffer
        'time_w': nrm((DIM + 1, DIM_COND), 0.1),       # Linear(dim+1, dim*4)
        'time_b': nrm((DIM_COND,), 0.1),
        'rms_gamma': nrm((1, DIM), 0.02),              # RMSNorm gamma
        'layers': [],
    }
    for ind in range(DEPTH):
        lyr = {}
        if ind >= DEPTH / 2:                            # latter half: unet skip proj
            lyr['skip_wa'] = nrm((DIM, DIM), 0.05)      # Linear(2*dim, dim) split
            lyr['skip_wb'] = nrm((DIM, DIM), 0.05)
        for prefix in ('attn', 'ff'):                   # AdaptiveWrapper params
            lyr[f'{prefix}_lng'] = nrm((1, DIM), 0.02)
            lyr[f'{prefix}_lscale'] = nrm((1, DIM), 0.02)
            lyr[f'{prefix}_film_w'] = nrm((DIM_COND, 2 * DIM), 0.02)
            lyr[f'{prefix}_film_b'] = nrm((2 * DIM,), 0.02)
            lyr[f'{prefix}_ada_w'] = nrm((DIM_COND, DIM), 0.02)
            lyr[f'{prefix}_ada_b'] = nrm((DIM,), 0.02) - 2.0   # ada_ln_zero_init_bias
        # Attention (qkv weight pre-split per head: [heads, dim, dim_head] etc.)
        lyr['w_q'] = nrm((HEADS, DIM, DIM_HEAD), 0.05)
        lyr['w_k'] = nrm((HEADS, DIM, DIM_HEAD), 0.05)
        lyr['w_v'] = nrm((HEADS, DIM, DIM_HEAD), 0.05)
        lyr['w_g'] = nrm((HEADS, DIM, 1), 0.05)                # to_gates
        lyr['w_o'] = nrm((HEADS, DIM_HEAD, DIM), 0.05)         # to_out
        # FeedForward (GEGLU): Linear(dim, 2*inner) split into value/gate halves
        lyr['ff_w1a'] = nrm((DIM, FF_INNER), 0.05)
        lyr['ff_w1b'] = nrm((DIM, FF_INNER), 0.05)
        lyr['ff_b1a'] = nrm((1, FF_INNER), 0.02)
        lyr['ff_b1b'] = nrm((1, FF_INNER), 0.02)
        lyr['ff_w2'] = nrm((FF_INNER, DIM), 0.05)
        lyr['ff_b2'] = nrm((1, DIM), 0.02)
        params['layers'].append(lyr)
    return params


if __name__ == "__main__":
    key = jax.random.PRNGKey(0)
    pkey, xkey, tkey, mkey = jax.random.split(key, 4)

    params = init_params(pkey)
    packed = pack_weights(params)        # one-time packing, outside the per-call path

    x = jax.random.normal(xkey, (BATCH, SEQ, DIM), jnp.float32)
    times = jax.random.uniform(tkey, (BATCH,), jnp.float32)
    is_any_modality = jax.random.bernoulli(mkey, 0.5, (BATCH, SEQ))

    out = transformer_forward(packed, x, times, is_any_modality)
    out = jax.block_until_ready(out)
    assert out.shape == (BATCH, SEQ, DIM)

    ref = reference_forward(params, x, times, is_any_modality)
    np.testing.assert_allclose(np.asarray(out), np.asarray(ref), atol=2e-3, rtol=2e-3)

    print("KERNEL_OK")
</pallas_src>

<mosaic_0001>
module attributes {stable_mosaic.version = 11 : i64} {
  func.func @fused_transformer_kernel(%arg0: memref<16x32xf32, #tpu.memory_space<vmem>>, %arg1: memref<12x16x32xf32, #tpu.memory_space<vmem>>, %arg2: memref<224x128xf32, #tpu.memory_space<vmem>>, %arg3: memref<472x32xf32, #tpu.memory_space<vmem>>, %arg4: memref<16x32xf32, #tpu.memory_space<vmem>>) attributes {dimension_semantics = [], scalar_prefetch = 0 : i64, scratch_operands = 0 : i64, tpu.core_type = #tpu.core_type<tc>} {
    %c0 = arith.constant 0 : index
    %c0_0 = arith.constant 0 : index
    %0 = vector.load %arg0[%c0, %c0_0] : memref<16x32xf32, #tpu.memory_space<vmem>>, vector<16x32xf32>
    %1 = tpu.iota {dimensions = array<i32: 0>} : vector<16x16xi32>
    %2 = tpu.iota {dimensions = array<i32: 1>} : vector<16x16xi32>
    %c3_i32 = arith.constant 3 : i32
    %3 = vector.broadcast %c3_i32 : i32 to vector<16x16xi32>
    %4 = arith.shrsi %1, %3 : vector<16x16xi32>
    %c3_i32_1 = arith.constant 3 : i32
    %5 = vector.broadcast %c3_i32_1 : i32 to vector<16x16xi32>
    %6 = arith.shrsi %2, %5 : vector<16x16xi32>
    %7 = arith.cmpi eq, %4, %6 : vector<16x16xi32>
    %8 = arith.cmpi sle, %2, %1 : vector<16x16xi32>
    %9 = arith.andi %7, %8 : vector<16x16xi1>
    %cst = arith.constant 1.000000e+00 : f32
    %cst_2 = arith.constant 0.000000e+00 : f32
    %10 = vector.broadcast %cst : f32 to vector<16x16xf32>
    %11 = vector.broadcast %cst_2 : f32 to vector<16x16xf32>
    %12 = arith.select %9, %10, %11 : vector<16x16xi1>, vector<16x16xf32>
    %cst_3 = arith.constant dense<0.000000e+00> : vector<16xf32>
    %13 = vector.multi_reduction <add>, %0, %cst_3 [1] : vector<16x32xf32> to vector<16xf32>
    %14 = vector.shape_cast %13 : vector<16xf32> to vector<16x1xf32>
    %cst_4 = arith.constant 3.200000e+01 : f32
    %15 = vector.broadcast %cst_4 : f32 to vector<16x1xf32>
    %16 = arith.divf %14, %15 : vector<16x1xf32>
    %17 = arith.mulf %0, %0 : vector<16x32xf32>
    %cst_5 = arith.constant dense<0.000000e+00> : vector<16xf32>
    %18 = vector.multi_reduction <add>, %17, %cst_5 [1] : vector<16x32xf32> to vector<16xf32>
    %19 = vector.shape_cast %18 : vector<16xf32> to vector<16x1xf32>
    %cst_6 = arith.constant 3.200000e+01 : f32
    %20 = vector.broadcast %cst_6 : f32 to vector<16x1xf32>
    %21 = arith.divf %19, %20 : vector<16x1xf32>
    %22 = vector.broadcast %16 : vector<16x1xf32> to vector<16x32xf32>
    %23 = arith.subf %0, %22 : vector<16x32xf32>
    %24 = arith.mulf %16, %16 : vector<16x1xf32>
    %25 = arith.subf %21, %24 : vector<16x1xf32>
    %cst_7 = arith.constant 9.99999974E-6 : f32
    %26 = vector.broadcast %cst_7 : f32 to vector<16x1xf32>
    %27 = arith.addf %25, %26 : vector<16x1xf32>
    %28 = math.rsqrt %27 : vector<16x1xf32>
    %29 = vector.broadcast %28 : vector<16x1xf32> to vector<16x32xf32>
    %30 = arith.mulf %23, %29 : vector<16x32xf32>
    %c0_8 = arith.constant 0 : index
    %c0_9 = arith.constant 0 : index
    %c0_10 = arith.constant 0 : index
    %31 = vector.load %arg1[%c0_8, %c0_9, %c0_10] : memref<12x16x32xf32, #tpu.memory_space<vmem>>, vector<1x16x32xf32>
    %32 = vector.shape_cast %31 : vector<1x16x32xf32> to vector<16x32xf32>
    %33 = arith.mulf %30, %32 : vector<16x32xf32>
    %c1 = arith.constant 1 : index
    %c0_11 = arith.constant 0 : index
    %c0_12 = arith.constant 0 : index
    %34 = vector.load %arg1[%c1, %c0_11, %c0_12] : memref<12x16x32xf32, #tpu.memory_space<vmem>>, vector<1x16x32xf32>
    %35 = vector.shape_cast %34 : vector<1x16x32xf32> to vector<16x32xf32>
    %36 = arith.addf %33, %35 : vector<16x32xf32>
    %c0_13 = arith.constant 0 : index
    %c0_14 = arith.constant 0 : index
    %37 = vector.load %arg2[%c0_13, %c0_14] : memref<224x128xf32, #tpu.memory_space<vmem>>, vector<32x128xf32>
    %cst_15 = arith.constant dense<0.000000e+00> : vector<16x128xf32>
    %38 = tpu.matmul %36, %37, %cst_15 {dimension_numbers = #tpu.dot_dimension_numbers<[1], [0], [0], [1], [0, 0, 1, 1], [], []>} : vector<16x32xf32>, vector<32x128xf32>, vector<16x128xf32> -> vector<16x128xf32>
    %39 = vector.extract_strided_slice %38 {offsets = [0, 96], sizes = [16, 4], strides = [1, 1]} : vector<16x128xf32> to vector<16x4xf32>
    %40 = arith.negf %39 : vector<16x4xf32>
    %41 = math.exp %40 : vector<16x4xf32>
    %cst_16 = arith.constant 1.000000e+00 : f32
    %42 = vector.broadcast %cst_16 : f32 to vector<16x4xf32>
    %43 = arith.addf %42, %41 : vector<16x4xf32>
    %44 = arith.divf %42, %43 : vector<16x4xf32>
    %c0_17 = arith.constant 0 : index
    %c0_18 = arith.constant 0 : index
    %45 = vector.load %arg3[%c0_17, %c0_18] : memref<472x32xf32, #tpu.memory_space<vmem>>, vector<32x32xf32>
    %cst_19 = arith.constant 0.000000e+00 : f32
    %46 = vector.broadcast %cst_19 : f32 to vector<16x32xf32>
    %47 = vector.extract_strided_slice %38 {offsets = [0, 0], sizes = [16, 8], strides = [1, 1]} : vector<16x128xf32> to vector<16x8xf32>
    %cst_20 = arith.constant 0.353553385 : f32
    %48 = vector.broadcast %cst_20 : f32 to vector<16x8xf32>
    %49 = arith.mulf %47, %48 : vector<16x8xf32>
    %50 = vector.extract_strided_slice %38 {offsets = [0, 32], sizes = [16, 8], strides = [1, 1]} : vector<16x128xf32> to vector<16x8xf32>
    %51 = vector.extract_strided_slice %38 {offsets = [0, 64], sizes = [16, 8], strides = [1, 1]} : vector<16x128xf32> to vector<16x8xf32>
    %cst_21 = arith.constant dense<0.000000e+00> : vector<16x16xf32>
    %52 = tpu.matmul %49, %50, %cst_21 {dimension_numbers = #tpu.dot_dimension_numbers<[1], [1], [0], [0], [0, 0, 1, 0], [], []>} : vector<16x8xf32>, vector<16x8xf32>, vector<16x16xf32> -> vector<16x16xf32>
    %cst_22 = arith.constant 2.000000e-02 : f32
    %53 = vector.broadcast %cst_22 : f32 to vector<16x16xf32>
    %54 = arith.mulf %52, %53 : vector<16x16xf32>
    %55 = math.tanh %54 : vector<16x16xf32>
    %cst_23 = arith.constant 5.000000e+01 : f32
    %56 = vector.broadcast %cst_23 : f32 to vector<16x16xf32>
    %57 = arith.mulf %55, %56 : vector<16x16xf32>
    %58 = math.exp %57 : vector<16x16xf32>
    %59 = arith.mulf %58, %12 : vector<16x16xf32>
    %cst_24 = arith.constant dense<0.000000e+00> : vector<16xf32>
    %60 = vector.multi_reduction <add>, %59, %cst_24 [1] : vector<16x16xf32> to vector<16xf32>
    %61 = vector.shape_cast %60 : vector<16xf32> to vector<16x1xf32>
    %62 = tpu.reciprocal %61 {approx = true} : vector<16x1xf32> -> vector<16x1xf32>
    %63 = vector.broadcast %62 : vector<16x1xf32> to vector<16x16xf32>
    %64 = arith.mulf %59, %63 : vector<16x16xf32>
    %cst_25 = arith.constant dense<0.000000e+00> : vector<16x8xf32>
    %65 = tpu.matmul %64, %51, %cst_25 {dimension_numbers = #tpu.dot_dimension_numbers<[1], [0], [0], [1], [0, 0, 1, 1], [], []>} : vector<16x16xf32>, vector<16x8xf32>, vector<16x8xf32> -> vector<16x8xf32>
    %66 = vector.extract_strided_slice %44 {offsets = [0, 0], sizes = [16, 1], strides = [1, 1]} : vector<16x4xf32> to vector<16x1xf32>
    %67 = vector.broadcast %66 : vector<16x1xf32> to vector<16x8xf32>
    %68 = arith.mulf %65, %67 : vector<16x8xf32>
    %69 = vector.extract_strided_slice %45 {offsets = [0, 0], sizes = [8, 32], strides = [1, 1]} : vector<32x32xf32> to vector<8x32xf32>
    %cst_26 = arith.constant dense<0.000000e+00> : vector<16x32xf32>
    %70 = tpu.matmul %68, %69, %cst_26 {dimension_numbers = #tpu.dot_dimension_numbers<[1], [0], [0], [1], [0, 0, 1, 1], [], []>} : vector<16x8xf32>, vector<8x32xf32>, vector<16x32xf32> -> vector<16x32xf32>
    %71 = arith.addf %46, %70 : vector<16x32xf32>
    %72 = vector.extract_strided_slice %38 {offsets = [0, 8], sizes = [16, 8], strides = [1, 1]} : vector<16x128xf32> to vector<16x8xf32>
    %cst_27 = arith.constant 0.353553385 : f32
    %73 = vector.broadcast %cst_27 : f32 to vector<16x8xf32>
    %74 = arith.mulf %72, %73 : vector<16x8xf32>
    %75 = vector.extract_strided_slice %38 {offsets = [0, 40], sizes = [16, 8], strides = [1, 1]} : vector<16x128xf32> to vector<16x8xf32>
    %76 = vector.extract_strided_slice %38 {offsets = [0, 72], sizes = [16, 8], strides = [1, 1]} : vector<16x128xf32> to vector<16x8xf32>
    %cst_28 = arith.constant dense<0.000000e+00> : vector<16x16xf32>
    %77 = tpu.matmul %74, %75, %cst_28 {dimension_numbers = #tpu.dot_dimension_numbers<[1], [1], [0], [0], [0, 0, 1, 0], [], []>} : vector<16x8xf32>, vector<16x8xf32>, vector<16x16xf32> -> vector<16x16xf32>
    %cst_29 = arith.constant 2.000000e-02 : f32
    %78 = vector.broadcast %cst_29 : f32 to vector<16x16xf32>
    %79 = arith.mulf %77, %78 : vector<16x16xf32>
    %80 = math.tanh %79 : vector<16x16xf32>
    %cst_30 = arith.constant 5.000000e+01 : f32
    %81 = vector.broadcast %cst_30 : f32 to vector<16x16xf32>
    %82 = arith.mulf %80, %81 : vector<16x16xf32>
    %83 = math.exp %82 : vector<16x16xf32>
    %84 = arith.mulf %83, %12 : vector<16x16xf32>
    %cst_31 = arith.constant dense<0.000000e+00> : vector<16xf32>
    %85 = vector.multi_reduction <add>, %84, %cst_31 [1] : vector<16x16xf32> to vector<16xf32>
    %86 = vector.shape_cast %85 : vector<16xf32> to vector<16x1xf32>
    %87 = tpu.reciprocal %86 {approx = true} : vector<16x1xf32> -> vector<16x1xf32>
    %88 = vector.broadcast %87 : vector<16x1xf32> to vector<16x16xf32>
    %89 = arith.mulf %84, %88 : vector<16x16xf32>
    %cst_32 = arith.constant dense<0.000000e+00> : vector<16x8xf32>
    %90 = tpu.matmul %89, %76, %cst_32 {dimension_numbers = #tpu.dot_dimension_numbers<[1], [0], [0], [1], [0, 0, 1, 1], [], []>} : vector<16x16xf32>, vector<16x8xf32>, vector<16x8xf32> -> vector<16x8xf32>
    %91 = vector.extract_strided_slice %44 {offsets = [0, 1], sizes = [16, 1], strides = [1, 1]} : vector<16x4xf32> to vector<16x1xf32>
    %92 = vector.broadcast %91 : vector<16x1xf32> to vector<16x8xf32>
    %93 = arith.mulf %90, %92 : vector<16x8xf32>
    %94 = vector.extract_strided_slice %45 {offsets = [8, 0], sizes = [8, 32], strides = [1, 1]} : vector<32x32xf32> to vector<8x32xf32>
    %cst_33 = arith.constant dense<0.000000e+00> : vector<16x32xf32>
    %95 = tpu.matmul %93, %94, %cst_33 {dimension_numbers = #tpu.dot_dimension_numbers<[1], [0], [0], [1], [0, 0, 1, 1], [], []>} : vector<16x8xf32>, vector<8x32xf32>, vector<16x32xf32> -> vector<16x32xf32>
    %96 = arith.addf %71, %95 : vector<16x32xf32>
    %97 = vector.extract_strided_slice %38 {offsets = [0, 16], sizes = [16, 8], strides = [1, 1]} : vector<16x128xf32> to vector<16x8xf32>
    %cst_34 = arith.constant 0.353553385 : f32
    %98 = vector.broadcast %cst_34 : f32 to vector<16x8xf32>
    %99 = arith.mulf %97, %98 : vector<16x8xf32>
    %100 = vector.extract_strided_slice %38 {offsets = [0, 48], sizes = [16, 8], strides = [1, 1]} : vector<16x128xf32> to vector<16x8xf32>
    %101 = vector.extract_strided_slice %38 {offsets = [0, 80], sizes = [16, 8], strides = [1, 1]} : vector<16x128xf32> to vector<16x8xf32>
    %cst_35 = arith.constant dense<0.000000e+00> : vector<16x16xf32>
    %102 = tpu.matmul %99, %100, %cst_35 {dimension_numbers = #tpu.dot_dimension_numbers<[1], [1], [0], [0], [0, 0, 1, 0], [], []>} : vector<16x8xf32>, vector<16x8xf32>, vector<16x16xf32> -> vector<16x16xf32>
    %cst_36 = arith.constant 2.000000e-02 : f32
    %103 = vector.broadcast %cst_36 : f32 to vector<16x16xf32>
    %104 = arith.mulf %102, %103 : vector<16x16xf32>
    %105 = math.tanh %104 : vector<16x16xf32>
    %cst_37 = arith.constant 5.000000e+01 : f32
    %106 = vector.broadcast %cst_37 : f32 to vector<16x16xf32>
    %107 = arith.mulf %105, %106 : vector<16x16xf32>
    %108 = math.exp %107 : vector<16x16xf32>
    %109 = arith.mulf %108, %12 : vector<16x16xf32>
    %cst_38 = arith.constant dense<0.000000e+00> : vector<16xf32>
    %110 = vector.multi_reduction <add>, %109, %cst_38 [1] : vector<16x16xf32> to vector<16xf32>
    %111 = vector.shape_cast %110 : vector<16xf32> to vector<16x1xf32>
    %112 = tpu.reciprocal %111 {approx = true} : vector<16x1xf32> -> vector<16x1xf32>
    %113 = vector.broadcast %112 : vector<16x1xf32> to vector<16x16xf32>
    %114 = arith.mulf %109, %113 : vector<16x16xf32>
    %cst_39 = arith.constant dense<0.000000e+00> : vector<16x8xf32>
    %115 = tpu.matmul %114, %101, %cst_39 {dimension_numbers = #tpu.dot_dimension_numbers<[1], [0], [0], [1], [0, 0, 1, 1], [], []>} : vector<16x16xf32>, vector<16x8xf32>, vector<16x8xf32> -> vector<16x8xf32>
    %116 = vector.extract_strided_slice %44 {offsets = [0, 2], sizes = [16, 1], strides = [1, 1]} : vector<16x4xf32> to vector<16x1xf32>
    %117 = vector.broadcast %116 : vector<16x1xf32> to vector<16x8xf32>
    %118 = arith.mulf %115, %117 : vector<16x8xf32>
    %119 = vector.extract_strided_slice %45 {offsets = [16, 0], sizes = [8, 32], strides = [1, 1]} : vector<32x32xf32> to vector<8x32xf32>
    %cst_40 = arith.constant dense<0.000000e+00> : vector<16x32xf32>
    %120 = tpu.matmul %118, %119, %cst_40 {dimension_numbers = #tpu.dot_dimension_numbers<[1], [0], [0], [1], [0, 0, 1, 1], [], []>} : vector<16x8xf32>, vector<8x32xf32>, vector<16x32xf32> -> vector<16x32xf32>
    %121 = arith.addf %96, %120 : vector<16x32xf32>
    %122 = vector.extract_strided_slice %38 {offsets = [0, 24], sizes = [16, 8], strides = [1, 1]} : vector<16x128xf32> to vector<16x8xf32>
    %cst_41 = arith.constant 0.353553385 : f32
    %123 = vector.broadcast %cst_41 : f32 to vector<16x8xf32>
    %124 = arith.mulf %122, %123 : vector<16x8xf32>
    %125 = vector.extract_strided_slice %38 {offsets = [0, 56], sizes = [16, 8], strides = [1, 1]} : vector<16x128xf32> to vector<16x8xf32>
    %126 = vector.extract_strided_slice %38 {offsets = [0, 88], sizes = [16, 8], strides = [1, 1]} : vector<16x128xf32> to vector<16x8xf32>
    %cst_42 = arith.constant dense<0.000000e+00> : vector<16x16xf32>
    %127 = tpu.matmul %124, %125, %cst_42 {dimension_numbers = #tpu.dot_dimension_numbers<[1], [1], [0], [0], [0, 0, 1, 0], [], []>} : vector<16x8xf32>, vector<16x8xf32>, vector<16x16xf32> -> vector<16x16xf32>
    %cst_43 = arith.constant 2.000000e-02 : f32
    %128 = vector.broadcast %cst_43 : f32 to vector<16x16xf32>
    %129 = arith.mulf %127, %128 : vector<16x16xf32>
    %130 = math.tanh %129 : vector<16x16xf32>
    %cst_44 = arith.constant 5.000000e+01 : f32
    %131 = vector.broadcast %cst_44 : f32 to vector<16x16xf32>
    %132 = arith.mulf %130, %131 : vector<16x16xf32>
    %133 = math.exp %132 : vector<16x16xf32>
    %134 = arith.mulf %133, %12 : vector<16x16xf32>
    %cst_45 = arith.constant dense<0.000000e+00> : vector<16xf32>
    %135 = vector.multi_reduction <add>, %134, %cst_45 [1] : vector<16x16xf32> to vector<16xf32>
    %136 = vector.shape_cast %135 : vector<16xf32> to vector<16x1xf32>
    %137 = tpu.reciprocal %136 {approx = true} : vector<16x1xf32> -> vector<16x1xf32>
    %138 = vector.broadcast %137 : vector<16x1xf32> to vector<16x16xf32>
    %139 = arith.mulf %134, %138 : vector<16x16xf32>
    %cst_46 = arith.constant dense<0.000000e+00> : vector<16x8xf32>
    %140 = tpu.matmul %139, %126, %cst_46 {dimension_numbers = #tpu.dot_dimension_numbers<[1], [0], [0], [1], [0, 0, 1, 1], [], []>} : vector<16x16xf32>, vector<16x8xf32>, vector<16x8xf32> -> vector<16x8xf32>
    %141 = vector.extract_strided_slice %44 {offsets = [0, 3], sizes = [16, 1], strides = [1, 1]} : vector<16x4xf32> to vector<16x1xf32>
    %142 = vector.broadcast %141 : vector<16x1xf32> to vector<16x8xf32>
    %143 = arith.mulf %140, %142 : vector<16x8xf32>
    %144 = vector.extract_strided_slice %45 {offsets = [24, 0], sizes = [8, 32], strides = [1, 1]} : vector<32x32xf32> to vector<8x32xf32>
    %cst_47 = arith.constant dense<0.000000e+00> : vector<16x32xf32>
    %145 = tpu.matmul %143, %144, %cst_47 {dimension_numbers = #tpu.dot_dimension_numbers<[1], [0], [0], [1], [0, 0, 1, 1], [], []>} : vector<16x8xf32>, vector<8x32xf32>, vector<16x32xf32> -> vector<16x32xf32>
    %146 = arith.addf %121, %145 : vector<16x32xf32>
    %c2 = arith.constant 2 : index
    %c0_48 = arith.constant 0 : index
    %c0_49 = arith.constant 0 : index
    %147 = vector.load %arg1[%c2, %c0_48, %c0_49] : memref<12x16x32xf32, #tpu.memory_space<vmem>>, vector<1x16x32xf32>
    %148 = vector.shape_cast %147 : vector<1x16x32xf32> to vector<16x32xf32>
    %149 = arith.mulf %146, %148 : vector<16x32xf32>
    %150 = arith.addf %0, %149 : vector<16x32xf32>
    %cst_50 = arith.constant dense<0.000000e+00> : vector<16xf32>
    %151 = vector.multi_reduction <add>, %150, %cst_50 [1] : vector<16x32xf32> to vector<16xf32>
    %152 = vector.shape_cast %151 : vector<16xf32> to vector<16x1xf32>
    %cst_51 = arith.constant 3.200000e+01 : f32
    %153 = vector.broadcast %cst_51 : f32 to vector<16x1xf32>
    %154 = arith.divf %152, %153 : vector<16x1xf32>
    %155 = arith.mulf %150, %150 : vector<16x32xf32>
    %cst_52 = arith.constant dense<0.000000e+00> : vector<16xf32>
    %156 = vector.multi_reduction <add>, %155, %cst_52 [1] : vector<16x32xf32> to vector<16xf32>
    %157 = vector.shape_cast %156 : vector<16xf32> to vector<16x1xf32>
    %cst_53 = arith.constant 3.200000e+01 : f32
    %158 = vector.broadcast %cst_53 : f32 to vector<16x1xf32>
    %159 = arith.divf %157, %158 : vector<16x1xf32>
    %160 = vector.broadcast %154 : vector<16x1xf32> to vector<16x32xf32>
    %161 = arith.subf %150, %160 : vector<16x32xf32>
    %162 = arith.mulf %154, %154 : vector<16x1xf32>
    %163 = arith.subf %159, %162 : vector<16x1xf32>
    %cst_54 = arith.constant 9.99999974E-6 : f32
    %164 = vector.broadcast %cst_54 : f32 to vector<16x1xf32>
    %165 = arith.addf %163, %164 : vector<16x1xf32>
    %166 = math.rsqrt %165 : vector<16x1xf32>
    %167 = vector.broadcast %166 : vector<16x1xf32> to vector<16x32xf32>
    %168 = arith.mulf %161, %167 : vector<16x32xf32>
    %c3 = arith.constant 3 : index
    %c0_55 = arith.constant 0 : index
    %c0_56 = arith.constant 0 : index
    %169 = vector.load %arg1[%c3, %c0_55, %c0_56] : memref<12x16x32xf32, #tpu.memory_space<vmem>>, vector<1x16x32xf32>
    %170 = vector.shape_cast %169 : vector<1x16x32xf32> to vector<16x32xf32>
    %171 = arith.mulf %168, %170 : vector<16x32xf32>
    %c4 = arith.constant 4 : index
    %c0_57 = arith.constant 0 : index
    %c0_58 = arith.constant 0 : index
    %172 = vector.load %arg1[%c4, %c0_57, %c0_58] : memref<12x16x32xf32, #tpu.memory_space<vmem>>, vector<1x16x32xf32>
    %173 = vector.shape_cast %172 : vector<1x16x32xf32> to vector<16x32xf32>
    %174 = arith.addf %171, %173 : vector<16x32xf32>
    %c32 = arith.constant 32 : index
    %c0_59 = arith.constant 0 : index
    %175 = vector.load %arg2[%c32, %c0_59] : memref<224x128xf32, #tpu.memory_space<vmem>>, vector<32x128xf32>
    %cst_60 = arith.constant dense<0.000000e+00> : vector<16x128xf32>
    %176 = tpu.matmul %174, %175, %cst_60 {dimension_numbers = #tpu.dot_dimension_numbers<[1], [0], [0], [1], [0, 0, 1, 1], [], []>} : vector<16x32xf32>, vector<32x128xf32>, vector<16x128xf32> -> vector<16x128xf32>
    %c96 = arith.constant 96 : index
    %c0_61 = arith.constant 0 : index
    %177 = vector.load %arg2[%c96, %c0_61] : memref<224x128xf32, #tpu.memory_space<vmem>>, vector<1x128xf32>
    %178 = vector.broadcast %177 : vector<1x128xf32> to vector<16x128xf32>
    %179 = arith.addf %176, %178 : vector<16x128xf32>
    %c64 = arith.constant 64 : index
    %c0_62 = arith.constant 0 : index
    %180 = vector.load %arg2[%c64, %c0_62] : memref<224x128xf32, #tpu.memory_space<vmem>>, vector<32x128xf32>
    %cst_63 = arith.constant dense<0.000000e+00> : vector<16x128xf32>
    %181 = tpu.matmul %174, %180, %cst_63 {dimension_numbers = #tpu.dot_dimension_numbers<[1], [0], [0], [1], [0, 0, 1, 1], [], []>} : vector<16x32xf32>, vector<32x128xf32>, vector<16x128xf32> -> vector<16x128xf32>
    %c104 = arith.constant 104 : index
    %c0_64 = arith.constant 0 : index
    %182 = vector.load %arg2[%c104, %c0_64] : memref<224x128xf32, #tpu.memory_space<vmem>>, vector<1x128xf32>
    %183 = vector.broadcast %182 : vector<1x128xf32> to vector<16x128xf32>
    %184 = arith.addf %181, %183 : vector<16x128xf32>
    %cst_65 = arith.constant 5.000000e-01 : f32
    %185 = vector.broadcast %cst_65 : f32 to vector<16x128xf32>
    %186 = arith.mulf %185, %184 : vector<16x128xf32>
    %cst_66 = arith.constant 4.471500e-02 : f32
    %187 = vector.broadcast %cst_66 : f32 to vector<16x128xf32>
    %188 = arith.mulf %187, %184 : vector<16x128xf32>
    %189 = arith.mulf %188, %184 : vector<16x128xf32>
    %190 = arith.mulf %189, %184 : vector<16x128xf32>
    %191 = arith.addf %184, %190 : vector<16x128xf32>
    %cst_67 = arith.constant 0.797884583 : f32
    %192 = vector.broadcast %cst_67 : f32 to vector<16x128xf32>
    %193 = arith.mulf %192, %191 : vector<16x128xf32>
    %194 = math.tanh %193 : vector<16x128xf32>
    %cst_68 = arith.constant 1.000000e+00 : f32
    %195 = vector.broadcast %cst_68 : f32 to vector<16x128xf32>
    %196 = arith.addf %195, %194 : vector<16x128xf32>
    %197 = arith.mulf %186, %196 : vector<16x128xf32>
    %198 = arith.mulf %197, %179 : vector<16x128xf32>
    %c32_69 = arith.constant 32 : index
    %c0_70 = arith.constant 0 : index
    %199 = vector.load %arg3[%c32_69, %c0_70] : memref<472x32xf32, #tpu.memory_space<vmem>>, vector<128x32xf32>
    %cst_71 = arith.constant dense<0.000000e+00> : vector<16x32xf32>
    %200 = tpu.matmul %198, %199, %cst_71 {dimension_numbers = #tpu.dot_dimension_numbers<[1], [0], [0], [1], [0, 0, 1, 1], [], []>} : vector<16x128xf32>, vector<128x32xf32>, vector<16x32xf32> -> vector<16x32xf32>
    %c160 = arith.constant 160 : index
    %c0_72 = arith.constant 0 : index
    %201 = vector.load %arg3[%c160, %c0_72] : memref<472x32xf32, #tpu.memory_space<vmem>>, vector<1x32xf32>
    %202 = vector.broadcast %201 : vector<1x32xf32> to vector<16x32xf32>
    %203 = arith.addf %200, %202 : vector<16x32xf32>
    %c5 = arith.constant 5 : index
    %c0_73 = arith.constant 0 : index
    %c0_74 = arith.constant 0 : index
    %204 = vector.load %arg1[%c5, %c0_73, %c0_74] : memref<12x16x32xf32, #tpu.memory_space<vmem>>, vector<1x16x32xf32>
    %205 = vector.shape_cast %204 : vector<1x16x32xf32> to vector<16x32xf32>
    %206 = arith.mulf %203, %205 : vector<16x32xf32>
    %207 = arith.addf %150, %206 : vector<16x32xf32>
    %c400 = arith.constant 400 : index
    %c0_75 = arith.constant 0 : index
    %208 = vector.load %arg3[%c400, %c0_75] : memref<472x32xf32, #tpu.memory_space<vmem>>, vector<64x32xf32>
    %209 = vector.extract_strided_slice %208 {offsets = [0, 0], sizes = [32, 32], strides = [1, 1]} : vector<64x32xf32> to vector<32x32xf32>
    %cst_76 = arith.constant dense<0.000000e+00> : vector<16x32xf32>
    %210 = tpu.matmul %207, %209, %cst_76 {dimension_numbers = #tpu.dot_dimension_numbers<[1], [0], [0], [1], [0, 0, 1, 1], [], []>} : vector<16x32xf32>, vector<32x32xf32>, vector<16x32xf32> -> vector<16x32xf32>
    %211 = vector.extract_strided_slice %208 {offsets = [32, 0], sizes = [32, 32], strides = [1, 1]} : vector<64x32xf32> to vector<32x32xf32>
    %cst_77 = arith.constant dense<0.000000e+00> : vector<16x32xf32>
    %212 = tpu.matmul %0, %211, %cst_77 {dimension_numbers = #tpu.dot_dimension_numbers<[1], [0], [0], [1], [0, 0, 1, 1], [], []>} : vector<16x32xf32>, vector<32x32xf32>, vector<16x32xf32> -> vector<16x32xf32>
    %213 = arith.addf %210, %212 : vector<16x32xf32>
    %214 = arith.addf %207, %213 : vector<16x32xf32>
    %cst_78 = arith.constant dense<0.000000e+00> : vector<16xf32>
    %215 = vector.multi_reduction <add>, %214, %cst_78 [1] : vector<16x32xf32> to vector<16xf32>
    %216 = vector.shape_cast %215 : vector<16xf32> to vector<16x1xf32>
    %cst_79 = arith.constant 3.200000e+01 : f32
    %217 = vector.broadcast %cst_79 : f32 to vector<16x1xf32>
    %218 = arith.divf %216, %217 : vector<16x1xf32>
    %219 = arith.mulf %214, %214 : vector<16x32xf32>
    %cst_80 = arith.constant dense<0.000000e+00> : vector<16xf32>
    %220 = vector.multi_reduction <add>, %219, %cst_80 [1] : vector<16x32xf32> to vector<16xf32>
    %221 = vector.shape_cast %220 : vector<16xf32> to vector<16x1xf32>
    %cst_81 = arith.constant 3.200000e+01 : f32
    %222 = vector.broadcast %cst_81 : f32 to vector<16x1xf32>
    %223 = arith.divf %221, %222 : vector<16x1xf32>
    %224 = vector.broadcast %218 : vector<16x1xf32> to vector<16x32xf32>
    %225 = arith.subf %214, %224 : vector<16x32xf32>
    %226 = arith.mulf %218, %218 : vector<16x1xf32>
    %227 = arith.subf %223, %226 : vector<16x1xf32>
    %cst_82 = arith.constant 9.99999974E-6 : f32
    %228 = vector.broadcast %cst_82 : f32 to vector<16x1xf32>
    %229 = arith.addf %227, %228 : vector<16x1xf32>
    %230 = math.rsqrt %229 : vector<16x1xf32>
    %231 = vector.broadcast %230 : vector<16x1xf32> to vector<16x32xf32>
    %232 = arith.mulf %225, %231 : vector<16x32xf32>
    %c6 = arith.constant 6 : index
    %c0_83 = arith.constant 0 : index
    %c0_84 = arith.constant 0 : index
    %233 = vector.load %arg1[%c6, %c0_83, %c0_84] : memref<12x16x32xf32, #tpu.memory_space<vmem>>, vector<1x16x32xf32>
    %234 = vector.shape_cast %233 : vector<1x16x32xf32> to vector<16x32xf32>
    %235 = arith.mulf %232, %234 : vector<16x32xf32>
    %c7 = arith.constant 7 : index
    %c0_85 = arith.constant 0 : index
    %c0_86 = arith.constant 0 : index
    %236 = vector.load %arg1[%c7, %c0_85, %c0_86] : memref<12x16x32xf32, #tpu.memory_space<vmem>>, vector<1x16x32xf32>
    %237 = vector.shape_cast %236 : vector<1x16x32xf32> to vector<16x32xf32>
    %238 = arith.addf %235, %237 : vector<16x32xf32>
    %c112 = arith.constant 112 : index
    %c0_87 = arith.constant 0 : index
    %239 = vector.load %arg2[%c112, %c0_87] : memref<224x128xf32, #tpu.memory_space<vmem>>, vector<32x128xf32>
    %cst_88 = arith.constant dense<0.000000e+00> : vector<16x128xf32>
    %240 = tpu.matmul %238, %239, %cst_88 {dimension_numbers = #tpu.dot_dimension_numbers<[1], [0], [0], [1], [0, 0, 1, 1], [], []>} : vector<16x32xf32>, vector<32x128xf32>, vector<16x128xf32> -> vector<16x128xf32>
    %241 = vector.extract_strided_slice %240 {offsets = [0, 96], sizes = [16, 4], strides = [1, 1]} : vector<16x128xf32> to vector<16x4xf32>
    %242 = arith.negf %241 : vector<16x4xf32>
    %243 = math.exp %242 : vector<16x4xf32>
    %cst_89 = arith.constant 1.000000e+00 : f32
    %244 = vector.broadcast %cst_89 : f32 to vector<16x4xf32>
    %245 = arith.addf %244, %243 : vector<16x4xf32>
    %246 = arith.divf %244, %245 : vector<16x4xf32>
    %c232 = arith.constant 232 : index
    %c0_90 = arith.constant 0 : index
    %247 = vector.load %arg3[%c232, %c0_90] : memref<472x32xf32, #tpu.memory_space<vmem>>, vector<32x32xf32>
    %cst_91 = arith.constant 0.000000e+00 : f32
    %248 = vector.broadcast %cst_91 : f32 to vector<16x32xf32>
    %249 = vector.extract_strided_slice %240 {offsets = [0, 0], sizes = [16, 8], strides = [1, 1]} : vector<16x128xf32> to vector<16x8xf32>
    %cst_92 = arith.constant 0.353553385 : f32
    %250 = vector.broadcast %cst_92 : f32 to vector<16x8xf32>
    %251 = arith.mulf %249, %250 : vector<16x8xf32>
    %252 = vector.extract_strided_slice %240 {offsets = [0, 32], sizes = [16, 8], strides = [1, 1]} : vector<16x128xf32> to vector<16x8xf32>
    %253 = vector.extract_strided_slice %240 {offsets = [0, 64], sizes = [16, 8], strides = [1, 1]} : vector<16x128xf32> to vector<16x8xf32>
    %cst_93 = arith.constant dense<0.000000e+00> : vector<16x16xf32>
    %254 = tpu.matmul %251, %252, %cst_93 {dimension_numbers = #tpu.dot_dimension_numbers<[1], [1], [0], [0], [0, 0, 1, 0], [], []>} : vector<16x8xf32>, vector<16x8xf32>, vector<16x16xf32> -> vector<16x16xf32>
    %cst_94 = arith.constant 2.000000e-02 : f32
    %255 = vector.broadcast %cst_94 : f32 to vector<16x16xf32>
    %256 = arith.mulf %254, %255 : vector<16x16xf32>
    %257 = math.tanh %256 : vector<16x16xf32>
    %cst_95 = arith.constant 5.000000e+01 : f32
    %258 = vector.broadcast %cst_95 : f32 to vector<16x16xf32>
    %259 = arith.mulf %257, %258 : vector<16x16xf32>
    %260 = math.exp %259 : vector<16x16xf32>
    %261 = arith.mulf %260, %12 : vector<16x16xf32>
    %cst_96 = arith.constant dense<0.000000e+00> : vector<16xf32>
    %262 = vector.multi_reduction <add>, %261, %cst_96 [1] : vector<16x16xf32> to vector<16xf32>
    %263 = vector.shape_cast %262 : vector<16xf32> to vector<16x1xf32>
    %264 = tpu.reciprocal %263 {approx = true} : vector<16x1xf32> -> vector<16x1xf32>
    %265 = vector.broadcast %264 : vector<16x1xf32> to vector<16x16xf32>
    %266 = arith.mulf %261, %265 : vector<16x16xf32>
    %cst_97 = arith.constant dense<0.000000e+00> : vector<16x8xf32>
    %267 = tpu.matmul %266, %253, %cst_97 {dimension_numbers = #tpu.dot_dimension_numbers<[1], [0], [0], [1], [0, 0, 1, 1], [], []>} : vector<16x16xf32>, vector<16x8xf32>, vector<16x8xf32> -> vector<16x8xf32>
    %268 = vector.extract_strided_slice %246 {offsets = [0, 0], sizes = [16, 1], strides = [1, 1]} : vector<16x4xf32> to vector<16x1xf32>
    %269 = vector.broadcast %268 : vector<16x1xf32> to vector<16x8xf32>
    %270 = arith.mulf %267, %269 : vector<16x8xf32>
    %271 = vector.extract_strided_slice %247 {offsets = [0, 0], sizes = [8, 32], strides = [1, 1]} : vector<32x32xf32> to vector<8x32xf32>
    %cst_98 = arith.constant dense<0.000000e+00> : vector<16x32xf32>
    %272 = tpu.matmul %270, %271, %cst_98 {dimension_numbers = #tpu.dot_dimension_numbers<[1], [0], [0], [1], [0, 0, 1, 1], [], []>} : vector<16x8xf32>, vector<8x32xf32>, vector<16x32xf32> -> vector<16x32xf32>
    %273 = arith.addf %248, %272 : vector<16x32xf32>
    %274 = vector.extract_strided_slice %240 {offsets = [0, 8], sizes = [16, 8], strides = [1, 1]} : vector<16x128xf32> to vector<16x8xf32>
    %cst_99 = arith.constant 0.353553385 : f32
    %275 = vector.broadcast %cst_99 : f32 to vector<16x8xf32>
    %276 = arith.mulf %274, %275 : vector<16x8xf32>
    %277 = vector.extract_strided_slice %240 {offsets = [0, 40], sizes = [16, 8], strides = [1, 1]} : vector<16x128xf32> to vector<16x8xf32>
    %278 = vector.extract_strided_slice %240 {offsets = [0, 72], sizes = [16, 8], strides = [1, 1]} : vector<16x128xf32> to vector<16x8xf32>
    %cst_100 = arith.constant dense<0.000000e+00> : vector<16x16xf32>
    %279 = tpu.matmul %276, %277, %cst_100 {dimension_numbers = #tpu.dot_dimension_numbers<[1], [1], [0], [0], [0, 0, 1, 0], [], []>} : vector<16x8xf32>, vector<16x8xf32>, vector<16x16xf32> -> vector<16x16xf32>
    %cst_101 = arith.constant 2.000000e-02 : f32
    %280 = vector.broadcast %cst_101 : f32 to vector<16x16xf32>
    %281 = arith.mulf %279, %280 : vector<16x16xf32>
    %282 = math.tanh %281 : vector<16x16xf32>
    %cst_102 = arith.constant 5.000000e+01 : f32
    %283 = vector.broadcast %cst_102 : f32 to vector<16x16xf32>
    %284 = arith.mulf %282, %283 : vector<16x16xf32>
    %285 = math.exp %284 : vector<16x16xf32>
    %286 = arith.mulf %285, %12 : vector<16x16xf32>
    %cst_103 = arith.constant dense<0.000000e+00> : vector<16xf32>
    %287 = vector.multi_reduction <add>, %286, %cst_103 [1] : vector<16x16xf32> to vector<16xf32>
    %288 = vector.shape_cast %287 : vector<16xf32> to vector<16x1xf32>
    %289 = tpu.reciprocal %288 {approx = true} : vector<16x1xf32> -> vector<16x1xf32>
    %290 = vector.broadcast %289 : vector<16x1xf32> to vector<16x16xf32>
    %291 = arith.mulf %286, %290 : vector<16x16xf32>
    %cst_104 = arith.constant dense<0.000000e+00> : vector<16x8xf32>
    %292 = tpu.matmul %291, %278, %cst_104 {dimension_numbers = #tpu.dot_dimension_numbers<[1], [0], [0], [1], [0, 0, 1, 1], [], []>} : vector<16x16xf32>, vector<16x8xf32>, vector<16x8xf32> -> vector<16x8xf32>
    %293 = vector.extract_strided_slice %246 {offsets = [0, 1], sizes = [16, 1], strides = [1, 1]} : vector<16x4xf32> to vector<16x1xf32>
    %294 = vector.broadcast %293 : vector<16x1xf32> to vector<16x8xf32>
    %295 = arith.mulf %292, %294 : vector<16x8xf32>
    %296 = vector.extract_strided_slice %247 {offsets = [8, 0], sizes = [8, 32], strides = [1, 1]} : vector<32x32xf32> to vector<8x32xf32>
    %cst_105 = arith.constant dense<0.000000e+00> : vector<16x32xf32>
    %297 = tpu.matmul %295, %296, %cst_105 {dimension_numbers = #tpu.dot_dimension_numbers<[1], [0], [0], [1], [0, 0, 1, 1], [], []>} : vector<16x8xf32>, vector<8x32xf32>, vector<16x32xf32> -> vector<16x32xf32>
    %298 = arith.addf %273, %297 : vector<16x32xf32>
    %299 = vector.extract_strided_slice %240 {offsets = [0, 16], sizes = [16, 8], strides = [1, 1]} : vector<16x128xf32> to vector<16x8xf32>
    %cst_106 = arith.constant 0.353553385 : f32
    %300 = vector.broadcast %cst_106 : f32 to vector<16x8xf32>
    %301 = arith.mulf %299, %300 : vector<16x8xf32>
    %302 = vector.extract_strided_slice %240 {offsets = [0, 48], sizes = [16, 8], strides = [1, 1]} : vector<16x128xf32> to vector<16x8xf32>
    %303 = vector.extract_strided_slice %240 {offsets = [0, 80], sizes = [16, 8], strides = [1, 1]} : vector<16x128xf32> to vector<16x8xf32>
    %cst_107 = arith.constant dense<0.000000e+00> : vector<16x16xf32>
    %304 = tpu.matmul %301, %302, %cst_107 {dimension_numbers = #tpu.dot_dimension_numbers<[1], [1], [0], [0], [0, 0, 1, 0], [], []>} : vector<16x8xf32>, vector<16x8xf32>, vector<16x16xf32> -> vector<16x16xf32>
    %cst_108 = arith.constant 2.000000e-02 : f32
    %305 = vector.broadcast %cst_108 : f32 to vector<16x16xf32>
    %306 = arith.mulf %304, %305 : vector<16x16xf32>
    %307 = math.tanh %306 : vector<16x16xf32>
    %cst_109 = arith.constant 5.000000e+01 : f32
    %308 = vector.broadcast %cst_109 : f32 to vector<16x16xf32>
    %309 = arith.mulf %307, %308 : vector<16x16xf32>
    %310 = math.exp %309 : vector<16x16xf32>
    %311 = arith.mulf %310, %12 : vector<16x16xf32>
    %cst_110 = arith.constant dense<0.000000e+00> : vector<16xf32>
    %312 = vector.multi_reduction <add>, %311, %cst_110 [1] : vector<16x16xf32> to vector<16xf32>
    %313 = vector.shape_cast %312 : vector<16xf32> to vector<16x1xf32>
    %314 = tpu.reciprocal %313 {approx = true} : vector<16x1xf32> -> vector<16x1xf32>
    %315 = vector.broadcast %314 : vector<16x1xf32> to vector<16x16xf32>
    %316 = arith.mulf %311, %315 : vector<16x16xf32>
    %cst_111 = arith.constant dense<0.000000e+00> : vector<16x8xf32>
    %317 = tpu.matmul %316, %303, %cst_111 {dimension_numbers = #tpu.dot_dimension_numbers<[1], [0], [0], [1], [0, 0, 1, 1], [], []>} : vector<16x16xf32>, vector<16x8xf32>, vector<16x8xf32> -> vector<16x8xf32>
    %318 = vector.extract_strided_slice %246 {offsets = [0, 2], sizes = [16, 1], strides = [1, 1]} : vector<16x4xf32> to vector<16x1xf32>
    %319 = vector.broadcast %318 : vector<16x1xf32> to vector<16x8xf32>
    %320 = arith.mulf %317, %319 : vector<16x8xf32>
    %321 = vector.extract_strided_slice %247 {offsets = [16, 0], sizes = [8, 32], strides = [1, 1]} : vector<32x32xf32> to vector<8x32xf32>
    %cst_112 = arith.constant dense<0.000000e+00> : vector<16x32xf32>
    %322 = tpu.matmul %320, %321, %cst_112 {dimension_numbers = #tpu.dot_dimension_numbers<[1], [0], [0], [1], [0, 0, 1, 1], [], []>} : vector<16x8xf32>, vector<8x32xf32>, vector<16x32xf32> -> vector<16x32xf32>
    %323 = arith.addf %298, %322 : vector<16x32xf32>
    %324 = vector.extract_strided_slice %240 {offsets = [0, 24], sizes = [16, 8], strides = [1, 1]} : vector<16x128xf32> to vector<16x8xf32>
    %cst_113 = arith.constant 0.353553385 : f32
    %325 = vector.broadcast %cst_113 : f32 to vector<16x8xf32>
    %326 = arith.mulf %324, %325 : vector<16x8xf32>
    %327 = vector.extract_strided_slice %240 {offsets = [0, 56], sizes = [16, 8], strides = [1, 1]} : vector<16x128xf32> to vector<16x8xf32>
    %328 = vector.extract_strided_slice %240 {offsets = [0, 88], sizes = [16, 8], strides = [1, 1]} : vector<16x128xf32> to vector<16x8xf32>
    %cst_114 = arith.constant dense<0.000000e+00> : vector<16x16xf32>
    %329 = tpu.matmul %326, %327, %cst_114 {dimension_numbers = #tpu.dot_dimension_numbers<[1], [1], [0], [0], [0, 0, 1, 0], [], []>} : vector<16x8xf32>, vector<16x8xf32>, vector<16x16xf32> -> vector<16x16xf32>
    %cst_115 = arith.constant 2.000000e-02 : f32
    %330 = vector.broadcast %cst_115 : f32 to vector<16x16xf32>
    %331 = arith.mulf %329, %330 : vector<16x16xf32>
    %332 = math.tanh %331 : vector<16x16xf32>
    %cst_116 = arith.constant 5.000000e+01 : f32
    %333 = vector.broadcast %cst_116 : f32 to vector<16x16xf32>
    %334 = arith.mulf %332, %333 : vector<16x16xf32>
    %335 = math.exp %334 : vector<16x16xf32>
    %336 = arith.mulf %335, %12 : vector<16x16xf32>
    %cst_117 = arith.constant dense<0.000000e+00> : vector<16xf32>
    %337 = vector.multi_reduction <add>, %336, %cst_117 [1] : vector<16x16xf32> to vector<16xf32>
    %338 = vector.shape_cast %337 : vector<16xf32> to vector<16x1xf32>
    %339 = tpu.reciprocal %338 {approx = true} : vector<16x1xf32> -> vector<16x1xf32>
    %340 = vector.broadcast %339 : vector<16x1xf32> to vector<16x16xf32>
    %341 = arith.mulf %336, %340 : vector<16x16xf32>
    %cst_118 = arith.constant dense<0.000000e+00> : vector<16x8xf32>
    %342 = tpu.matmul %341, %328, %cst_118 {dimension_numbers = #tpu.dot_dimension_numbers<[1], [0], [0], [1], [0, 0, 1, 1], [], []>} : vector<16x16xf32>, vector<16x8xf32>, vector<16x8xf32> -> vector<16x8xf32>
    %343 = vector.extract_strided_slice %246 {offsets = [0, 3], sizes = [16, 1], strides = [1, 1]} : vector<16x4xf32> to vector<16x1xf32>
    %344 = vector.broadcast %343 : vector<16x1xf32> to vector<16x8xf32>
    %345 = arith.mulf %342, %344 : vector<16x8xf32>
    %346 = vector.extract_strided_slice %247 {offsets = [24, 0], sizes = [8, 32], strides = [1, 1]} : vector<32x32xf32> to vector<8x32xf32>
    %cst_119 = arith.constant dense<0.000000e+00> : vector<16x32xf32>
    %347 = tpu.matmul %345, %346, %cst_119 {dimension_numbers = #tpu.dot_dimension_numbers<[1], [0], [0], [1], [0, 0, 1, 1], [], []>} : vector<16x8xf32>, vector<8x32xf32>, vector<16x32xf32> -> vector<16x32xf32>
    %348 = arith.addf %323, %347 : vector<16x32xf32>
    %c8 = arith.constant 8 : index
    %c0_120 = arith.constant 0 : index
    %c0_121 = arith.constant 0 : index
    %349 = vector.load %arg1[%c8, %c0_120, %c0_121] : memref<12x16x32xf32, #tpu.memory_space<vmem>>, vector<1x16x32xf32>
    %350 = vector.shape_cast %349 : vector<1x16x32xf32> to vector<16x32xf32>
    %351 = arith.mulf %348, %350 : vector<16x32xf32>
    %352 = arith.addf %214, %351 : vector<16x32xf32>
    %cst_122 = arith.constant dense<0.000000e+00> : vector<16xf32>
    %353 = vector.multi_reduction <add>, %352, %cst_122 [1] : vector<16x32xf32> to vector<16xf32>
    %354 = vector.shape_cast %353 : vector<16xf32> to vector<16x1xf32>
    %cst_123 = arith.constant 3.200000e+01 : f32
    %355 = vector.broadcast %cst_123 : f32 to vector<16x1xf32>
    %356 = arith.divf %354, %355 : vector<16x1xf32>
    %357 = arith.mulf %352, %352 : vector<16x32xf32>
    %cst_124 = arith.constant dense<0.000000e+00> : vector<16xf32>
    %358 = vector.multi_reduction <add>, %357, %cst_124 [1] : vector<16x32xf32> to vector<16xf32>
    %359 = vector.shape_cast %358 : vector<16xf32> to vector<16x1xf32>
    %cst_125 = arith.constant 3.200000e+01 : f32
    %360 = vector.broadcast %cst_125 : f32 to vector<16x1xf32>
    %361 = arith.divf %359, %360 : vector<16x1xf32>
    %362 = vector.broadcast %356 : vector<16x1xf32> to vector<16x32xf32>
    %363 = arith.subf %352, %362 : vector<16x32xf32>
    %364 = arith.mulf %356, %356 : vector<16x1xf32>
    %365 = arith.subf %361, %364 : vector<16x1xf32>
    %cst_126 = arith.constant 9.99999974E-6 : f32
    %366 = vector.broadcast %cst_126 : f32 to vector<16x1xf32>
    %367 = arith.addf %365, %366 : vector<16x1xf32>
    %368 = math.rsqrt %367 : vector<16x1xf32>
    %369 = vector.broadcast %368 : vector<16x1xf32> to vector<16x32xf32>
    %370 = arith.mulf %363, %369 : vector<16x32xf32>
    %c9 = arith.constant 9 : index
    %c0_127 = arith.constant 0 : index
    %c0_128 = arith.constant 0 : index
    %371 = vector.load %arg1[%c9, %c0_127, %c0_128] : memref<12x16x32xf32, #tpu.memory_space<vmem>>, vector<1x16x32xf32>
    %372 = vector.shape_cast %371 : vector<1x16x32xf32> to vector<16x32xf32>
    %373 = arith.mulf %370, %372 : vector<16x32xf32>
    %c10 = arith.constant 10 : index
    %c0_129 = arith.constant 0 : index
    %c0_130 = arith.constant 0 : index
    %374 = vector.load %arg1[%c10, %c0_129, %c0_130] : memref<12x16x32xf32, #tpu.memory_space<vmem>>, vector<1x16x32xf32>
    %375 = vector.shape_cast %374 : vector<1x16x32xf32> to vector<16x32xf32>
    %376 = arith.addf %373, %375 : vector<16x32xf32>
    %c144 = arith.constant 144 : index
    %c0_131 = arith.constant 0 : index
    %377 = vector.load %arg2[%c144, %c0_131] : memref<224x128xf32, #tpu.memory_space<vmem>>, vector<32x128xf32>
    %cst_132 = arith.constant dense<0.000000e+00> : vector<16x128xf32>
    %378 = tpu.matmul %376, %377, %cst_132 {dimension_numbers = #tpu.dot_dimension_numbers<[1], [0], [0], [1], [0, 0, 1, 1], [], []>} : vector<16x32xf32>, vector<32x128xf32>, vector<16x128xf32> -> vector<16x128xf32>
    %c208 = arith.constant 208 : index
    %c0_133 = arith.constant 0 : index
    %379 = vector.load %arg2[%c208, %c0_133] : memref<224x128xf32, #tpu.memory_space<vmem>>, vector<1x128xf32>
    %380 = vector.broadcast %379 : vector<1x128xf32> to vector<16x128xf32>
    %381 = arith.addf %378, %380 : vector<16x128xf32>
    %c176 = arith.constant 176 : index
    %c0_134 = arith.constant 0 : index
    %382 = vector.load %arg2[%c176, %c0_134] : memref<224x128xf32, #tpu.memory_space<vmem>>, vector<32x128xf32>
    %cst_135 = arith.constant dense<0.000000e+00> : vector<16x128xf32>
    %383 = tpu.matmul %376, %382, %cst_135 {dimension_numbers = #tpu.dot_dimension_numbers<[1], [0], [0], [1], [0, 0, 1, 1], [], []>} : vector<16x32xf32>, vector<32x128xf32>, vector<16x128xf32> -> vector<16x128xf32>
    %c216 = arith.constant 216 : index
    %c0_136 = arith.constant 0 : index
    %384 = vector.load %arg2[%c216, %c0_136] : memref<224x128xf32, #tpu.memory_space<vmem>>, vector<1x128xf32>
    %385 = vector.broadcast %384 : vector<1x128xf32> to vector<16x128xf32>
    %386 = arith.addf %383, %385 : vector<16x128xf32>
    %cst_137 = arith.constant 5.000000e-01 : f32
    %387 = vector.broadcast %cst_137 : f32 to vector<16x128xf32>
    %388 = arith.mulf %387, %386 : vector<16x128xf32>
    %cst_138 = arith.constant 4.471500e-02 : f32
    %389 = vector.broadcast %cst_138 : f32 to vector<16x128xf32>
    %390 = arith.mulf %389, %386 : vector<16x128xf32>
    %391 = arith.mulf %390, %386 : vector<16x128xf32>
    %392 = arith.mulf %391, %386 : vector<16x128xf32>
    %393 = arith.addf %386, %392 : vector<16x128xf32>
    %cst_139 = arith.constant 0.797884583 : f32
    %394 = vector.broadcast %cst_139 : f32 to vector<16x128xf32>
    %395 = arith.mulf %394, %393 : vector<16x128xf32>
    %396 = math.tanh %395 : vector<16x128xf32>
    %cst_140 = arith.constant 1.000000e+00 : f32
    %397 = vector.broadcast %cst_140 : f32 to vector<16x128xf32>
    %398 = arith.addf %397, %396 : vector<16x128xf32>
    %399 = arith.mulf %388, %398 : vector<16x128xf32>
    %400 = arith.mulf %399, %381 : vector<16x128xf32>
    %c264 = arith.constant 264 : index
    %c0_141 = arith.constant 0 : index
    %401 = vector.load %arg3[%c264, %c0_141] : memref<472x32xf32, #tpu.memory_space<vmem>>, vector<128x32xf32>
    %cst_142 = arith.constant dense<0.000000e+00> : vector<16x32xf32>
    %402 = tpu.matmul %400, %401, %cst_142 {dimension_numbers = #tpu.dot_dimension_numbers<[1], [0], [0], [1], [0, 0, 1, 1], [], []>} : vector<16x128xf32>, vector<128x32xf32>, vector<16x32xf32> -> vector<16x32xf32>
    %c392 = arith.constant 392 : index
    %c0_143 = arith.constant 0 : index
    %403 = vector.load %arg3[%c392, %c0_143] : memref<472x32xf32, #tpu.memory_space<vmem>>, vector<1x32xf32>
    %404 = vector.broadcast %403 : vector<1x32xf32> to vector<16x32xf32>
    %405 = arith.addf %402, %404 : vector<16x32xf32>
    %c11 = arith.constant 11 : index
    %c0_144 = arith.constant 0 : index
    %c0_145 = arith.constant 0 : index
    %406 = vector.load %arg1[%c11, %c0_144, %c0_145] : memref<12x16x32xf32, #tpu.memory_space<vmem>>, vector<1x16x32xf32>
    %407 = vector.shape_cast %406 : vector<1x16x32xf32> to vector<16x32xf32>
    %408 = arith.mulf %405, %407 : vector<16x32xf32>
    %409 = arith.addf %352, %408 : vector<16x32xf32>
    %c464 = arith.constant 464 : index
    %c0_146 = arith.constant 0 : index
    %410 = vector.load %arg3[%c464, %c0_146] : memref<472x32xf32, #tpu.memory_space<vmem>>, vector<1x32xf32>
    %411 = arith.mulf %409, %409 : vector<16x32xf32>
    %cst_147 = arith.constant dense<0.000000e+00> : vector<16xf32>
    %412 = vector.multi_reduction <add>, %411, %cst_147 [1] : vector<16x32xf32> to vector<16xf32>
    %413 = vector.shape_cast %412 : vector<16xf32> to vector<16x1xf32>
    %cst_148 = arith.constant 1.000000e-24 : f32
    %414 = vector.broadcast %cst_148 : f32 to vector<16x1xf32>
    %415 = arith.maximumf %413, %414 : vector<16x1xf32>
    %416 = math.rsqrt %415 : vector<16x1xf32>
    %417 = vector.broadcast %416 : vector<16x1xf32> to vector<16x32xf32>
    %418 = arith.mulf %409, %417 : vector<16x32xf32>
    %cst_149 = arith.constant 5.65685415 : f32
    %419 = vector.broadcast %cst_149 : f32 to vector<16x32xf32>
    %420 = arith.mulf %418, %419 : vector<16x32xf32>
    %cst_150 = arith.constant 1.000000e+00 : f32
    %421 = vector.broadcast %cst_150 : f32 to vector<1x32xf32>
    %422 = arith.addf %410, %421 : vector<1x32xf32>
    %423 = vector.broadcast %422 : vector<1x32xf32> to vector<16x32xf32>
    %424 = arith.mulf %420, %423 : vector<16x32xf32>
    %c0_151 = arith.constant 0 : index
    %c0_152 = arith.constant 0 : index
    %425 = vector.load %arg4[%c0_151, %c0_152] : memref<16x32xf32, #tpu.memory_space<vmem>>, vector<16x32xf32>
    tpu.vector_store %arg4[%c0_151, %c0_152], %424 {strides = array<i32>} : memref<16x32xf32, #tpu.memory_space<vmem>>, vector<16x32xf32>,
    return
  }
}

</mosaic_0001>

<bundles_post_ra>
// kernel: transformer_forward.1
= control target key start
LH: loop header
LB: loop body
LE: loop exit
PB: predicated region body
PF: predicated region fallthrough
CT: control target
= control target key end

     0   :  { %vm36_vm0 = vcmask 261120   ;;  %s5429_s0 = inlined_call_operand.vmem [shape: f32[16,32], index: 0, kind: input, shape index: {}]   ;;  %s5430_s1 = inlined_call_operand.vmem [shape: f32[12,16,32], index: 1, kind: input, shape index: {}]   ;;  %s5431_s2 = inlined_call_operand.vmem [shape: f32[224,128], index: 2, kind: input, shape index: {}]   ;;  %s5432_s3 = inlined_call_operand.vmem [shape: f32[472,32], index: 3, kind: input, shape index: {}]   ;;  %s5433_s4 = inlined_call_operand.hbm [shape: f32[16,32], index: 4, kind: output, shape index: {}]  }
   0x1   :  { %v4706_v0 = vld [vmem:[%s5429_s0] sm:$0xff]  ;;  %v4711_v1 = vld [vmem:[%s5429_s0 + $0x8] sm:$0xff] }
   0x2   :  { %9 = vsyncpa [#allocation3], 0  ;;  %v37_v2 = vsel %vm36_vm0, %v4706_v0, 0.0  ;;  %v46_v3 = vmul.f32 %v4706_v0, %v4706_v0  ;;  %v47_v4 = vmul.f32 %v4711_v1, %v4711_v1  ;;  %v40_v6 = vsel %vm36_vm0, %v4711_v1, 0.0  ;;  %v77_v8 = vld [vmem:[%s5431_s2] sm:$0xff]  ;;  %v78_v9 = vld [vmem:[%s5431_s2 + $0x8] sm:$0xff] }
   0x3   :  { %38 = vadd.xlane.f32.xlu0 %v37_v2  ;;  %v79_v10 = vld [vmem:[%s5431_s2 + $0x10] sm:$0xff]  ;;  %v4161_v11 = vpack.c.bf16 %v78_v9, %v77_v8  ;;  %v80_v12 = vld [vmem:[%s5431_s2 + $0x18] sm:$0xff]  ;;  %v68_v30 = vld [vmem:[%s5430_s1] sm:$0xff]  ;;  %vm186_vm1 = vcmask 64512   ;;  %s4659_s8 = smov 88   ;;  %s4660_s9 = smov 96  }
   0x4   :  { %v48_v5 = vsel %vm36_vm0, %v46_v3, 0.0  ;;  %v51_v7 = vsel %vm36_vm0, %v47_v4, 0.0  ;;  %v4165_v13 = vpack.c.bf16 %v80_v12, %v79_v10  ;;  %v3567_v32 = vld [vmem:[%s5430_s1 + $0x10] sm:$0xff]  ;;  %v69_v36 = vld [vmem:[%s5430_s1 + $0x8] sm:$0xff]  ;;  %v3568_v39 = vld [vmem:[%s5430_s1 + $0x18] sm:$0xff]  ;;  %s4661_s10 = smov 80  }
   0x5   :  { %49 = vadd.xlane.f32.xlu1 %v48_v5  ;;  %4162 = vmatprep.subr.bf16.mxu0 %v4161_v11  ;;  %s4662_s11 = smov 120   ;;  %s4663_s12 = smov 112   ;;  %vm4783_vm2 = vmpackc.low %vm186_vm1, %vm186_vm1  ;;  %v4664_v2 = vmov 97   ;;  %vm284_vm9 = vcmask 130048  }
   0x6   :  { %4164 = vmatpush3.bf16.msra.mxu0 %v4161_v11  ;;  %4433 = vset.pattern.permute.xlu1 %v4664_v2  ;;  %v20_v11 = vlaneseq  ;;  %s4666_s13 = smov 64   ;;  %s4667_s14 = smov 72  }
   0x7   :  { %41 = vadd.xlane.f32.xlu0 %v40_v6  ;;  %4166 = vmatprep.subr.bf16.mxu0 %v4165_v13  ;;  %s4668_s15 = smov 104   ;;  %s4669_s16 = smov 56  }
   0x8   :  { %4432 = vset.pattern.permute.xlu0 %v4664_v2  ;;  %v4807_v12 = vshrl.u32 %v20_v11, 7  ;;  %s4672_s17 = smov 48   ;;  %s4674_s21 = smov 40  }
   0x9   :  { %52 = vadd.xlane.f32.xlu1 %v51_v7  ;;  %s4675_s29 = smov [#allocation2]  }
   0xa   :  { %4168 = vmatpush3.bf16.msra.mxu0 %v4165_v13  ;;  %s3556_s30 = sshll.u32 %s4675_s29, 4  ;;  %s3557_s30 = int_to_ptr.vmem [resolvable:$true] %s3556_s30 }
   0xb   :  { %p4640_p1 = scmp.lt.s32.totalorder %s3557_s30, %s3557_s30 }
  0x90   :  { %v39_v14 = vpop.xlane.xlu0 %38 }
  0x91   :  { %v44_v15 = vmul.f32 0.03125, %v39_v14 }
  0x92   :  { %v50_v16 = vpop.xlane.xlu1 %49 }
  0x93   :  { %v58_v17 = vmul.f32 %v44_v15, %v44_v15  ;;  %v54_v18 = vmul.f32 0.03125, %v50_v16  ;;  %v56_v28 = vsub.f32 %v4706_v0, %v44_v15  ;;  %v22_v15 = vadd.s32 8, %v4807_v12 }
  0x94   :  { %v42_v19 = vpop.xlane.xlu0 %41  ;;  %v24_v16 = vand.u32 127, %v20_v11  ;;  %v4671_v11 = vmov 96  }
  0x95   :  { %v60_v20 = vsub.f32 %v54_v18, %v58_v17  ;;  %v45_v21 = vmul.f32 0.03125, %v42_v19 }
  0x96   :  { %v53_v22 = vpop.xlane.xlu1 %52  ;;  %vm31_vm4 = vcmp.le.s32.totalorder %v24_v16, %v22_v15  ;;  %vm30_vm6 = vcmp.le.s32.totalorder %v24_v16, %v4807_v12 }
  0x97   :  { %v62_v23 = vadd.f32 1e-05, %v60_v20  ;;  %v59_v24 = vmul.f32 %v45_v21, %v45_v21  ;;  %v55_v25 = vmul.f32 0.03125, %v53_v22  ;;  %v57_v33 = vsub.f32 %v4711_v1, %v45_v21 }
  0x99   :  { %4495 = vrsqrt.f32 %v62_v23  ;;  %v61_v26 = vsub.f32 %v55_v25, %v59_v24  ;;  %v26_v25 = vshra.s32 %v22_v15, 3 }
  0x9b   :  { %v63_v27 = vadd.f32 1e-05, %v61_v26  ;;  %v27_v26 = vshra.s32 %v24_v16, 3 }
  0x9d   :  { %4497 = vrsqrt.f32 %v63_v27  ;;  %vm29_vm3 = vcmp.eq.s32.totalorder %v26_v25, %v27_v26 }
  0x9e   :  { %vm33_vm7 = vmand %vm29_vm3, %vm31_vm4 }
  0xa3   :  { %v4496_v29 = vpop.eup %4495 }
  0xa4   :  { %v66_v31 = vmul.f32 %v4496_v29, %v56_v28 }
  0xa6   :  { %v70_v34 = vmul.f32 %v68_v30, %v66_v31  ;;  %v25_v30 = vshra.s32 %v4807_v12, 3 }
  0xa7   :  { %v4498_v35 = vpop.eup %4497 }
  0xa8   :  { %v75_v37 = vadd.f32 %v3567_v32, %v70_v34  ;;  %v67_v38 = vmul.f32 %v4498_v35, %v57_v33  ;;  %vm28_vm5 = vcmp.eq.s32.totalorder %v25_v30, %v27_v26  ;;  %v4665_v32 = vmov 0.0  }
  0xa9   :  { %vm32_vm8 = vmand %vm28_vm5, %vm30_vm6  ;;  %v4812_v33 = vsel %vm33_vm7, 1.0, %v4665_v32 }
  0xaa   :  { %3859 = vmatprep.mubr.msk.f32.mxu0 %vm36_vm0, %v75_v37  ;;  %v71_v40 = vmul.f32 %v69_v36, %v67_v38  ;;  %v4814_v35 = vsel %vm32_vm8, 1.0, %v4665_v32 }
  0xac   :  { %v76_v41 = vadd.f32 %v3568_v39, %v71_v40 }
  0xae   :  { %3860 = vmatmul.mubr.msk.f32.vlgmr.msra.gmra.mrb[0].mxu0 %vm36_vm0, %v76_v41 }
 0x181   :  { %v4751_v42 = vpop.f32.mrb[0].mxu0 }
 0x182   :  { %v4753_v43 = vpop.f32.mrb[1].mxu0  ;;  %v4773_v46 = vmul.f32 0.35355338, %v4751_v42 }
 0x183   :  { %v4757_v44 = vpack.i.bf16 %v4751_v42, %v4753_v43  ;;  %v4760_v45 = vmul.f32 0.35355338, %v4753_v43 }
 0x185   :  { %4408 = vrot.lane.b32.xlu1 %v4757_v44, %s4659_s8  ;;  %4403 = vrot.lane.b32.xlu0 %v4757_v44, %s4660_s9 }
 0x186   :  { %3866 = vmatprep.mubr.msk.f32.mxu0 %vm186_vm1, %v4760_v45 }
 0x189   :  { %4413 = vrot.lane.b32.xlu0 %v4757_v44, %s4661_s10  ;;  %394 = vrot.lane.b32.xlu1 %v4760_v45, %s4662_s11 }
 0x18d   :  { %768 = vrot.lane.b32.xlu0 %v4773_v46, %s4663_s12  ;;  %396 = vrot.lane.b32.xlu1 %v4773_v46, %s4662_s11 }
 0x191   :  { %766 = vrot.lane.b32.xlu1 %v4760_v45, %s4663_s12 }
 0x1f7   :  { %v4409_v47 = vpop.permute.xlu1 %4408  ;;  %v4404_v48 = vpop.permute.xlu0 %4403 }
 0x1f8   :  { %v4411_v49 = vunpack.i.h.bf16 %v4409_v47  ;;  %v4410_v50 = vunpack.i.l.bf16 %v4409_v47  ;;  %v4406_v51 = vunpack.i.h.bf16 %v4404_v48  ;;  %v4405_v52 = vunpack.i.l.bf16 %v4404_v48 }
 0x1fa   :  { %v4169_v54 = vpack.c.bf16 %v4406_v51, %v4405_v52  ;;  %v4179_v55 = vpack.c.bf16 %v4411_v49, %v4410_v50 }
 0x1fb   :  { %v4414_v56 = vpop.permute.xlu0 %4413  ;;  %v395_v57 = vpop.permute.xlu1 %394 }
 0x1fc   :  { %v4416_v58 = vunpack.i.h.bf16 %v4414_v56  ;;  %v4415_v59 = vunpack.i.l.bf16 %v4414_v56  ;;  %4171 = vmatprep.subr.msk.bf16.mxu0 %vm4783_vm2, %v4169_v54  ;;  %4181 = vmatprep.subr.msk.bf16.mxu1 %vm4783_vm2, %v4179_v55 }
 0x1fd   :  { %3880 = vmatprep.mubr.msk.f32.mxu1 %vm186_vm1, %v395_v57  ;;  %4174 = vmatpush3.bf16.xpose.msk.msra.mxu0 %vm4783_vm2, %v4169_v54 }
 0x1fe   :  { %v4189_v60 = vpack.c.bf16 %v4416_v58, %v4415_v59  ;;  %4184 = vmatpush3.bf16.xpose.msk.msra.mxu1 %vm4783_vm2, %v4179_v55 }
 0x1ff   :  { %v397_v61 = vpop.permute.xlu1 %396  ;;  %v769_v63 = vpop.permute.xlu0 %768 }
 0x200   :  { %4191 = vmatprep.subr.msk.bf16.mxu1 %vm4783_vm2, %v4189_v60 }
 0x203   :  { %v767_v62 = vpop.permute.xlu1 %766 }
 0x204   :  { %3867 = vmatmul.mubr.msk.f32.vlgmr.msra.gmra.mrb[2].mxu0 %vm186_vm1, %v4773_v46 }
 0x205   :  { %3881 = vmatmul.mubr.msk.f32.vlgmr.msra.gmra.mrb[0].mxu1 %vm186_vm1, %v397_v61  ;;  %v3571_v61 = vmul.f32 -1.442695, %v4753_v43 }
 0x206   :  { %4194 = vmatpush3.bf16.xpose.msk.msra.mxu1 %vm4783_vm2, %v4189_v60  ;;  %3904 = vmatprep.mubr.msk.f32.mxu1 %vm186_vm1, %v767_v62 }
 0x20d   :  { %3905 = vmatmul.mubr.msk.f32.vlgmr.msra.gmra.mrb[2].mxu1 %vm186_vm1, %v769_v63 }
 0x2d7   :  { %v3868_v3 = vpop.f32.mrb[2].mxu0 }
 0x2d8   :  { %v273_v4 = vmul.f32 0.02, %v3868_v3  ;;  %v3882_v5 = vpop.f32.mrb[0].mxu1  ;;  %v263_v6 = vpop.f32.mrb[3].mxu0 }
 0x2d9   :  { %v486_v7 = vmul.f32 0.02, %v3882_v5  ;;  %v272_v8 = vmul.f32 0.02, %v263_v6  ;;  %v476_v9 = vpop.f32.mrb[1].mxu1 }
 0x2da   :  { %4499 = vtanh.f32 %v273_v4  ;;  %v485_v10 = vmul.f32 0.02, %v476_v9 }
 0x2db   :  { %4501 = vtanh.f32 %v486_v7 }
 0x2dc   :  { %4503 = vtanh.f32 %v272_v8 }
 0x2dd   :  { %4505 = vtanh.f32 %v485_v10  ;;  %v4670_v10 = vmov 98  }
 0x2e0   :  { %v3906_v13 = vpop.f32.mrb[2].mxu1 }
 0x2e1   :  { %v848_v14 = vpop.f32.mrb[3].mxu1  ;;  %v858_v54 = vmul.f32 0.02, %v3906_v13 }
 0x2e2   :  { %v857_v52 = vmul.f32 0.02, %v848_v14 }
 0x2e4   :  { %v4500_v17 = vpop.eup %4499 }
 0x2e5   :  { %v4502_v18 = vpop.eup %4501  ;;  %v277_v19 = vmul.f32 50.0, %v4500_v17 }
 0x2e6   :  { %v4504_v20 = vpop.eup %4503  ;;  %v490_v21 = vmul.f32 50.0, %v4502_v18 }
 0x2e7   :  { %v4506_v22 = vpop.eup %4505  ;;  %v280_v23 = vmul.f32 1.442695, %v277_v19  ;;  %v276_v24 = vmul.f32 50.0, %v4504_v20 }
 0x2e8   :  { %v493_v27 = vmul.f32 1.442695, %v490_v21  ;;  %v489_v28 = vmul.f32 50.0, %v4506_v22 }
 0x2e9   :  { %4507 = vpow2.f32 %v280_v23  ;;  %v278_v29 = vmul.f32 1.442695, %v276_v24 }
 0x2ea   :  { %4509 = vpow2.f32 %v493_v27  ;;  %v491_v31 = vmul.f32 1.442695, %v489_v28 }
 0x2eb   :  { %4511 = vpow2.f32 %v278_v29 }
 0x2ec   :  { %4513 = vpow2.f32 %v491_v31 }
 0x2ed   :  { %4515 = vtanh.f32 %v857_v52 }
 0x2ee   :  { %4517 = vtanh.f32 %v858_v54 }
 0x2f3   :  { %v4508_v34 = vpop.eup %4507 }
 0x2f4   :  { %v4510_v36 = vpop.eup %4509  ;;  %v4817_v37 = vmul.f32 %v4508_v34, %v4812_v33 }
 0x2f5   :  { %v4512_v38 = vpop.eup %4511  ;;  %v4825_v41 = vmul.f32 %v4510_v36, %v4812_v33 }
 0x2f6   :  { %v288_v39 = vsel %vm284_vm9, %v4817_v37, 0.0  ;;  %v4822_v40 = vmul.f32 %v4512_v38, %v4814_v35  ;;  %v4514_v47 = vpop.eup %4513 }
 0x2f7   :  { %289 = vadd.xlane.f32.xlu0 %v288_v39  ;;  %v500_v49 = vsel %vm284_vm9, %v4825_v41, 0.0  ;;  %v4832_v50 = vmul.f32 %v4514_v47, %v4814_v35  ;;  %v4516_v55 = vpop.eup %4515  ;;  %v175_v47 = vld [vmem:[%s5432_s3 + $0x8] sm:$0xff] }
 0x2f8   :  { %v285_v48 = vsel %vm284_vm9, %v4822_v40, 0.0  ;;  %v861_v56 = vmul.f32 50.0, %v4516_v55  ;;  %v4518_v57 = vpop.eup %4517 }
 0x2f9   :  { %286 = vadd.xlane.f32.xlu1 %v285_v48  ;;  %v497_v51 = vsel %vm284_vm9, %v4832_v50, 0.0  ;;  %v862_v59 = vmul.f32 50.0, %v4518_v57  ;;  %v174_v48 = vld [vmem:[%s5432_s3] sm:$0xff] }
 0x2fa   :  { %v863_v58 = vmul.f32 1.442695, %v861_v56 }
 0x2fb   :  { %501 = vadd.xlane.f32.xlu0 %v500_v49  ;;  %v865_v60 = vmul.f32 1.442695, %v862_v59  ;;  %v4673_v49 = vmov 99  }
 0x2fc   :  { %4519 = vpow2.f32 %v863_v58 }
 0x2fd   :  { %4521 = vpow2.f32 %v865_v60 }
 0x2fe   :  { %4523 = vpow2.f32 %v3571_v61 }
 0x2ff   :  { %498 = vadd.xlane.f32.xlu0 %v497_v51 }
 0x306   :  { %v4520_v62 = vpop.eup %4519 }
 0x307   :  { %v4849_v63 = vmul.f32 %v4520_v62, %v4814_v35  ;;  %v4522_v3 = vpop.eup %4521 }
 0x308   :  { %v4854_v4 = vmul.f32 %v4522_v3, %v4812_v33  ;;  %v4524_v5 = vpop.eup %4523 }
 0x30a   :  { %4418 = vrot.lane.b32.xlu1 %v4757_v44, %s4666_s13  ;;  %v872_v43 = vsel %vm284_vm9, %v4854_v4, 0.0 }
 0x30e   :  { %4428 = vrot.lane.b32.xlu1 %v4757_v44, %s4667_s14 }
 0x312   :  { %1059 = vrot.lane.b32.xlu1 %v4760_v45, %s4668_s15  ;;  %v3572_v45 = vmul.f32 -1.442695, %v4751_v42  ;;  %v168_v42 = vadd.f32 1.0, %v4524_v5 }
 0x314   :  { %4525 = vpow2.f32 %v3572_v45 }
 0x315   :  { %4423 = vrot.lane.b32.xlu0 %v4757_v44, %s4669_s16  ;;  %4527 = vrcp.f32 %v168_v42 }
 0x316   :  { %1061 = vrot.lane.b32.xlu1 %v4773_v46, %s4668_s15  ;;  %v869_v46 = vsel %vm284_vm9, %v4849_v63, 0.0 }
 0x31e   :  { %v4526_v6 = vpop.eup %4525 }
 0x31f   :  { %v169_v7 = vadd.f32 1.0, %v4526_v6  ;;  %v4858_v8 = vpop.eup %4527 }
 0x321   :  { %4529 = vrcp.f32 %v169_v7 }
 0x32b   :  { %v4860_v9 = vpop.eup %4529 }
 0x334   :  { %870 = vadd.xlane.f32.xlu0 %v869_v46 }
 0x33a   :  { %873 = vadd.xlane.f32.xlu1 %v872_v43 }
 0x34a   :  { %595 = vperm.xlu0 %4432, %v4858_v8  }
 0x34b   :  { %599 = vperm.xlu1 %4433, %v4860_v9  }
 0x34e   :  { %4441 = vset.pattern.permute.xlu0 %v4670_v10 }
 0x34f   :  { %4434 = vset.pattern.permute.xlu1 %v4671_v11 }
 0x350   :  { %384 = vperm.xlu1 %4434, %v4858_v8  }
 0x354   :  { %389 = vperm.xlu1 %4434, %v4860_v9  }
 0x358   :  { %4436 = vrot.lane.b32.xlu1 %v4757_v44, %s4672_s17 }
 0x359   :  { %4440 = vset.pattern.permute.xlu1 %v4670_v10 }
 0x35c   :  { %967 = vperm.xlu1 %4440, %v4858_v8  }
 0x360   :  { %4447 = vset.pattern.permute.xlu1 %v4673_v49 }
 0x384   :  { %v290_v13 = vpop.xlane.xlu0 %289 }
 0x385   :  { %4531 = vrcp.f32 %v290_v13 }
 0x386   :  { %v287_v14 = vpop.xlane.xlu1 %286 }
 0x387   :  { %4533 = vrcp.f32 %v287_v14 }
 0x388   :  { %v502_v15 = vpop.xlane.xlu0 %501 }
 0x389   :  { %4535 = vrcp.f32 %v502_v15 }
 0x38a   :  { %v4419_v16 = vpop.permute.xlu1 %4418 }
 0x38b   :  { %v4421_v17 = vunpack.i.h.bf16 %v4419_v16  ;;  %v4420_v18 = vunpack.i.l.bf16 %v4419_v16 }
 0x38c   :  { %v499_v19 = vpop.xlane.xlu0 %498 }
 0x38d   :  { %v4175_v20 = vpack.c.bf16 %v4421_v17, %v4420_v18  ;;  %4537 = vrcp.f32 %v499_v19 }
 0x38e   :  { %v4429_v21 = vpop.permute.xlu1 %4428 }
 0x38f   :  { %v4431_v22 = vunpack.i.h.bf16 %v4429_v21  ;;  %v4430_v23 = vunpack.i.l.bf16 %v4429_v21  ;;  %4176 = vmatprep.subr.bf16.mxu0 %v4175_v20  ;;  %v4532_v24 = vpop.eup %4531 }
 0x390   :  { %4178 = vmatpush3.bf16.msra.mxu0 %v4175_v20  ;;  %v4424_v25 = vpop.permute.xlu0 %4423  ;;  %v294_v32 = vmul.f32 %v4532_v24, %v4817_v37 }
 0x391   :  { %v4534_v26 = vpop.eup %4533  ;;  %v4199_v27 = vpack.c.bf16 %v4431_v22, %v4430_v23  ;;  %v4426_v28 = vunpack.i.h.bf16 %v4424_v25  ;;  %v4425_v29 = vunpack.i.l.bf16 %v4424_v25 }
 0x392   :  { %v1060_v30 = vpop.permute.xlu1 %1059  ;;  %v293_v31 = vmul.f32 %v4534_v26, %v4822_v40 }
 0x393   :  { %v4185_v34 = vpack.c.bf16 %v4426_v28, %v4425_v29  ;;  %4201 = vmatprep.subr.msk.bf16.mxu1 %vm4783_vm2, %v4199_v27  ;;  %3923 = vmatprep.mubr.msk.f32.mxu1 %vm186_vm1, %v1060_v30  ;;  %v4536_v36 = vpop.eup %4535 }
 0x394   :  { %3873 = vmatprep.mubr.msk.f32.mxu0 %vm284_vm9, %v293_v31  ;;  %4204 = vmatpush3.bf16.xpose.msk.msra.mxu1 %vm4783_vm2, %v4199_v27  ;;  %v506_v37 = vmul.f32 %v4536_v36, %v4825_v41 }
 0x395   :  { %3874 = vmatmul.mubr.msk.f32.vlgmr.msra.gmra.mrb[4].mxu0 %vm284_vm9, %v294_v32  ;;  %4186 = vmatprep.subr.bf16.mxu0 %v4185_v34 }
 0x396   :  { %4188 = vmatpush3.bf16.msra.mxu0 %v4185_v34  ;;  %v1062_v40 = vpop.permute.xlu1 %1061 }
 0x397   :  { %v4538_v38 = vpop.eup %4537  ;;  %3890 = vmatprep.subr.mxu0 %v175_v47 }
 0x398   :  { %v505_v39 = vmul.f32 %v4538_v38, %v4832_v50 }
 0x39a   :  { %3887 = vmatprep.mubr.msk.f32.mxu0 %vm284_vm9, %v505_v39 }
 0x39b   :  { %3924 = vmatmul.mubr.msk.f32.vlgmr.msra.gmra.mrb[4].mxu1 %vm186_vm1, %v1062_v40  ;;  %3888 = vmatmul.mubr.msk.f32.vlgmr.msra.gmra.mrb[6].mxu0 %vm284_vm9, %v506_v37 }
 0x39c   :  { %3891 = vmatpush3.msra.mxu0 %v175_v47 }
 0x39d   :  { %3895 = vmatprep.subr.mxu0 %v174_v48 }
 0x3c1   :  { %v871_v55 = vpop.xlane.xlu0 %870 }
 0x3c2   :  { %4539 = vrcp.f32 %v871_v55 }
 0x3c7   :  { %v874_v41 = vpop.xlane.xlu1 %873 }
 0x3c8   :  { %4541 = vrcp.f32 %v874_v41  ;;  %v177_v41 = vld [vmem:[%s5432_s3 + $0x18] sm:$0xff] }
 0x3c9   :  { %v596_v58 = vpop.permute.xlu0 %595 }
 0x3cb   :  { %v600_v50 = vpop.permute.xlu1 %599 }
 0x3cc   :  { %v4540_v13 = vpop.eup %4539 }
 0x3cd   :  { %v877_v16 = vmul.f32 %v4540_v13, %v4849_v63  ;;  %v1399_v13 = vld [vmem:[%s5431_s2 + $0x20] sm:$0xff] }
 0x3cf   :  { %v385_v51 = vpop.permute.xlu1 %384 }
 0x3d2   :  { %v4542_v15 = vpop.eup %4541 }
 0x3d3   :  { %v390_v52 = vpop.permute.xlu1 %389  ;;  %v878_v20 = vmul.f32 %v4542_v15, %v4854_v4  ;;  %v176_v4 = vld [vmem:[%s5432_s3 + $0x10] sm:$0xff]  ;;  %v1489_v15 = vld [vmem:[%s5431_s2 + $0x40] sm:$0xff] }
 0x3d7   :  { %v4437_v57 = vpop.permute.xlu1 %4436 }
 0x3d8   :  { %v4439_v61 = vunpack.i.h.bf16 %v4437_v57  ;;  %v4438_v45 = vunpack.i.l.bf16 %v4437_v57  ;;  %v3606_v57 = vld [vmem:[%s5430_s1 + $0x28] sm:$0xff] }
 0x3da   :  { %v4195_v7 = vpack.c.bf16 %v4439_v61, %v4438_v45 }
 0x3db   :  { %v968_v29 = vpop.permute.xlu1 %967 }
 0x468   :  { %v3875_v54 = vpop.f32.mrb[4].mxu0 }
 0x469   :  { %v373_v56 = vpop.f32.mrb[5].mxu0  ;;  %v393_v14 = vmul.f32 %v3875_v54, %v390_v52 }
 0x46a   :  { %v392_v42 = vmul.f32 %v385_v51, %v373_v56 }
 0x46e   :  { %v3925_v59 = vpop.f32.mrb[4].mxu1  ;;  %v3889_v60 = vpop.f32.mrb[6].mxu0 }
 0x46f   :  { %v1151_v62 = vmul.f32 0.02, %v3925_v59  ;;  %v1141_v3 = vpop.f32.mrb[5].mxu1  ;;  %v585_v46 = vpop.f32.mrb[7].mxu0  ;;  %v603_v43 = vmul.f32 %v3889_v60, %v600_v50 }
 0x470   :  { %v1150_v5 = vmul.f32 0.02, %v1141_v3  ;;  %v602_v6 = vmul.f32 %v596_v58, %v585_v46  ;;  %v3605_v58 = vld [vmem:[%s5430_s1 + $0x20] sm:$0xff] }
 0x471   :  { %4543 = vtanh.f32 %v1151_v62 }
 0x472   :  { %4545 = vtanh.f32 %v1150_v5  ;;  %3892 = vmatprep.mubr.msk.f32.mxu0 %vm186_vm1, %v602_v6 }
 0x473   :  { %3893 = vmatmul.mubr.msk.f32.vlgmr.msra.gmra.mrb[8].mxu0 %vm186_vm1, %v603_v43 }
 0x474   :  { %3896 = vmatpush3.msra.mxu0 %v174_v48  ;;  %3897 = vmatprep.mubr.msk.f32.mxu0 %vm186_vm1, %v392_v42 }
 0x475   :  { %4196 = vmatprep.subr.bf16.mxu0 %v4195_v7 }
 0x47b   :  { %v4544_v17 = vpop.eup %4543  ;;  %3898 = vmatmul.mubr.msk.f32.vlgmr.msra.gmra.mrb[8].mxu0 %vm186_vm1, %v393_v14  ;;  %v1400_v14 = vld [vmem:[%s5431_s2 + $0x28] sm:$0xff] }
 0x47c   :  { %v4546_v18 = vpop.eup %4545  ;;  %v1155_v19 = vmul.f32 50.0, %v4544_v17  ;;  %4198 = vmatpush3.bf16.msra.mxu0 %v4195_v7  ;;  %3911 = vmatprep.mubr.msk.f32.mxu0 %vm284_vm9, %v877_v16  ;;  %v4209_v16 = vpack.c.bf16 %v1400_v14, %v1399_v13  ;;  %v1490_v17 = vld [vmem:[%s5431_s2 + $0x48] sm:$0xff]  ;;  %v1603_v13 = vld [vmem:[%s5432_s3 + $0x70] sm:$0xff] }
 0x47d   :  { %v1154_v21 = vmul.f32 50.0, %v4546_v18  ;;  %3914 = vmatprep.subr.mxu0 %v176_v4  ;;  %v4217_v18 = vpack.c.bf16 %v1490_v17, %v1489_v15  ;;  %v1604_v15 = vld [vmem:[%s5432_s3 + $0x78] sm:$0xff]  ;;  %v1605_v17 = vld [vmem:[%s5432_s3 + $0x80] sm:$0xff] }
 0x47e   :  { %v1158_v22 = vmul.f32 1.442695, %v1155_v19  ;;  %4210 = vmatprep.subr.bf16.mxu1 %v4209_v16  ;;  %v1401_v19 = vld [vmem:[%s5431_s2 + $0x30] sm:$0xff] }
 0x47f   :  { %v1156_v23 = vmul.f32 1.442695, %v1154_v21  ;;  %3912 = vmatmul.mubr.msk.f32.vlgmr.msra.gmra.mrb[10].mxu0 %vm284_vm9, %v878_v20  ;;  %v1402_v20 = vld [vmem:[%s5431_s2 + $0x38] sm:$0xff]  ;;  %4212 = vmatpush3.bf16.msra.mxu1 %v4209_v16  ;;  %v4245_v16 = vpack.c.bf16 %v1604_v15, %v1603_v13  ;;  %v3618_v15 = vld [vmem:[%s5430_s1 + $0x50] sm:$0xff] }
 0x480   :  { %4547 = vpow2.f32 %v1158_v22  ;;  %3915 = vmatpush3.msra.mxu0 %v176_v4  ;;  %v4213_v21 = vpack.c.bf16 %v1402_v20, %v1401_v19  ;;  %v1491_v22 = vld [vmem:[%s5431_s2 + $0x50] sm:$0xff] }
 0x481   :  { %4549 = vpow2.f32 %v1156_v23  ;;  %v1492_v23 = vld [vmem:[%s5431_s2 + $0x58] sm:$0xff]  ;;  %v1607_v20 = vld [vmem:[%s5432_s3 + $0x90] sm:$0xff] }
 0x482   :  { %4214 = vmatprep.subr.bf16.mxu1 %v4213_v21 }
 0x483   :  { %4216 = vmatpush3.bf16.msra.mxu1 %v4213_v21  ;;  %v1608_v21 = vld [vmem:[%s5432_s3 + $0x98] sm:$0xff] }
 0x48a   :  { %v4548_v24 = vpop.eup %4547 }
 0x48b   :  { %v4550_v25 = vpop.eup %4549  ;;  %v1161_v63 = vmul.f32 %v4548_v24, %v4812_v33  ;;  %v4221_v24 = vpack.c.bf16 %v1492_v23, %v1491_v22  ;;  %v4253_v22 = vpack.c.bf16 %v1608_v21, %v1607_v20  ;;  %v1700_v23 = vld [vmem:[%s5432_s3 + $0x1b0] sm:$0xff] }
 0x48c   :  { %v1160_v26 = vmul.f32 %v4550_v25, %v4814_v35 }
 0x48d   :  { %v1165_v27 = vsel %vm284_vm9, %v1161_v63, 0.0 }
 0x48e   :  { %1166 = vadd.xlane.f32.xlu0 %v1165_v27  ;;  %v1162_v28 = vsel %vm284_vm9, %v1160_v26, 0.0 }
 0x48f   :  { %1163 = vadd.xlane.f32.xlu1 %v1162_v28 }
 0x4a0   :  { %4443 = vrot.lane.b32.xlu1 %v4757_v44, %s4674_s21 }
 0x4a4   :  { %1260 = vperm.xlu1 %4447, %v4858_v8   ;;  %971 = vperm.xlu0 %4441, %v4860_v9  }
 0x4a8   :  { %1264 = vperm.xlu1 %4447, %v4860_v9   ;;  %4478 = vset.pattern.permute.xlu0 %v4664_v2 }
 0x4ac   :  { %4479 = vset.pattern.permute.xlu1 %v4664_v2 }
 0x51b   :  { %v1167_v36 = vpop.xlane.xlu0 %1166 }
 0x51c   :  { %v1164_v30 = vpop.xlane.xlu1 %1163 }
 0x51d   :  { %4551 = vrcp.f32 %v1164_v30 }
 0x51e   :  { %4553 = vrcp.f32 %v1167_v36 }
 0x520   :  { %v4444_v31 = vpop.permute.xlu1 %4443 }
 0x521   :  { %v4446_v44 = vunpack.i.h.bf16 %v4444_v31  ;;  %v4445_v32 = vunpack.i.l.bf16 %v4444_v31 }
 0x523   :  { %v4205_v34 = vpack.c.bf16 %v4446_v44, %v4445_v32  ;;  %v972_v37 = vpop.permute.xlu0 %971 }
 0x524   :  { %v1261_v50 = vpop.permute.xlu1 %1260 }
 0x525   :  { %4206 = vmatprep.subr.bf16.mxu0 %v4205_v34 }
 0x527   :  { %v4552_v38 = vpop.eup %4551 }
 0x528   :  { %v4554_v47 = vpop.eup %4553  ;;  %v1170_v2 = vmul.f32 %v4552_v38, %v1160_v26  ;;  %v1265_v54 = vpop.permute.xlu1 %1264 }
 0x529   :  { %v1171_v48 = vmul.f32 %v4554_v47, %v1161_v63 }
 0x552   :  { %v3913_v8 = vpop.f32.mrb[10].mxu0 }
 0x553   :  { %v957_v39 = vpop.f32.mrb[11].mxu0  ;;  %v975_v9 = vmul.f32 %v3913_v8, %v972_v37  ;;  %v3607_v37 = vld [vmem:[%s5430_s1 + $0x30] sm:$0xff] }
 0x554   :  { %v974_v40 = vmul.f32 %v968_v29, %v957_v39 }
 0x556   :  { %3916 = vmatprep.mubr.msk.f32.mxu0 %vm186_vm1, %v974_v40 }
 0x557   :  { %3917 = vmatmul.mubr.msk.f32.vlgmr.msra.gmra.mrb[8].mxu0 %vm186_vm1, %v975_v9  ;;  %v3609_v9 = vld [vmem:[%s5430_s1 + $0x40] sm:$0xff] }
 0x558   :  { %4208 = vmatpush3.bf16.msra.mxu0 %v4205_v34  ;;  %3930 = vmatprep.mubr.msk.f32.mxu0 %vm284_vm9, %v1170_v2 }
 0x559   :  { %3933 = vmatprep.subr.mxu0 %v177_v41 }
 0x55b   :  { %3931 = vmatmul.mubr.msk.f32.vlgmr.msra.gmra.mrb[12].mxu0 %vm284_vm9, %v1171_v48 }
 0x55c   :  { %3934 = vmatpush3.msra.mxu0 %v177_v41  ;;  %v3608_v41 = vld [vmem:[%s5430_s1 + $0x38] sm:$0xff] }
 0x55d   :  { %4218 = vmatprep.subr.bf16.mxu0 %v4217_v18 }
 0x62e   :  { %v3932_v51 = vpop.f32.mrb[12].mxu0 }
 0x62f   :  { %v1250_v52 = vpop.f32.mrb[13].mxu0  ;;  %v1268_v56 = vmul.f32 %v3932_v51, %v1265_v54 }
 0x630   :  { %v1267_v55 = vmul.f32 %v1261_v50, %v1250_v52  ;;  %v3610_v52 = vld [vmem:[%s5430_s1 + $0x48] sm:$0xff] }
 0x632   :  { %3935 = vmatprep.mubr.msk.f32.mxu0 %vm186_vm1, %v1267_v55 }
 0x633   :  { %3936 = vmatmul.mubr.msk.f32.vlgmr.msra.gmra.mrb[8].mxu0 %vm186_vm1, %v1268_v56  ;;  %v1593_v56 = vld [vmem:[%s5432_s3 + $0x20] sm:$0xff] }
 0x634   :  { %4220 = vmatpush3.bf16.msra.mxu0 %v4217_v18  ;;  %v1606_v18 = vld [vmem:[%s5432_s3 + $0x88] sm:$0xff] }
 0x635   :  { %4222 = vmatprep.subr.bf16.mxu0 %v4221_v24  ;;  %v4249_v19 = vpack.c.bf16 %v1606_v18, %v1605_v17 }
 0x638   :  { %4224 = vmatpush3.bf16.msra.mxu0 %v4221_v24  ;;  %v1701_v24 = vld [vmem:[%s5432_s3 + $0x1b8] sm:$0xff] }
 0x706   :  { %v3937_v59 = vpop.f32.mrb[8].mxu0 }
 0x707   :  { %v1356_v60 = vmul.f32 %v3937_v59, %v3606_v57  ;;  %v1341_v61 = vpop.f32.mrb[9].mxu0  ;;  %v1594_v57 = vld [vmem:[%s5432_s3 + $0x28] sm:$0xff]  ;;  %v1595_v59 = vld [vmem:[%s5432_s3 + $0x30] sm:$0xff] }
 0x708   :  { %v1355_v45 = vmul.f32 %v3605_v58, %v1341_v61  ;;  %v4225_v58 = vpack.c.bf16 %v1594_v57, %v1593_v56  ;;  %v1597_v61 = vld [vmem:[%s5432_s3 + $0x40] sm:$0xff] }
 0x709   :  { %v4931_v62 = vadd.f32 %v1356_v60, %v4711_v1  ;;  %v1596_v60 = vld [vmem:[%s5432_s3 + $0x38] sm:$0xff] }
 0x70a   :  { %v4934_v3 = vadd.f32 %v1355_v45, %v4706_v0  ;;  %4226 = vmatprep.subr.bf16.mxu1 %v4225_v58  ;;  %v1598_v45 = vld [vmem:[%s5432_s3 + $0x48] sm:$0xff] }
 0x70b   :  { %v1362_v46 = vsel %vm36_vm0, %v4931_v62, 0.0  ;;  %v1368_v42 = vmul.f32 %v4931_v62, %v4931_v62 }
 0x70c   :  { %1363 = vadd.xlane.f32.xlu0 %v1362_v46  ;;  %v1359_v5 = vsel %vm36_vm0, %v4934_v3, 0.0  ;;  %v1367_v6 = vmul.f32 %v4934_v3, %v4934_v3  ;;  %v4233_v46 = vpack.c.bf16 %v1598_v45, %v1597_v61  ;;  %v1697_v61 = vld [vmem:[%s5432_s3 + $0x198] sm:$0xff] }
 0x70d   :  { %1360 = vadd.xlane.f32.xlu1 %v1359_v5  ;;  %v1372_v7 = vsel %vm36_vm0, %v1368_v42, 0.0  ;;  %v1599_v5 = vld [vmem:[%s5432_s3 + $0x50] sm:$0xff]  ;;  %v1601_v42 = vld [vmem:[%s5432_s3 + $0x60] sm:$0xff] }
 0x70e   :  { %v1369_v43 = vsel %vm36_vm0, %v1367_v6, 0.0  ;;  %v1600_v6 = vld [vmem:[%s5432_s3 + $0x58] sm:$0xff] }
 0x711   :  { %1370 = vadd.xlane.f32.xlu1 %v1369_v43  ;;  %v4237_v43 = vpack.c.bf16 %v1600_v6, %v1599_v5  ;;  %v1699_v5 = vld [vmem:[%s5432_s3 + $0x1a8] sm:$0xff] }
 0x715   :  { %1373 = vadd.xlane.f32.xlu1 %v1372_v7  ;;  %v1602_v7 = vld [vmem:[%s5432_s3 + $0x68] sm:$0xff] }
 0x716   :  { %v4241_v14 = vpack.c.bf16 %v1602_v7, %v1601_v42  ;;  %v3619_v7 = vld [vmem:[%s5430_s1 + $0x58] sm:$0xff] }
 0x799   :  { %v1364_v26 = vpop.xlane.xlu0 %1363 }
 0x79a   :  { %v1361_v25 = vpop.xlane.xlu1 %1360  ;;  %v1366_v28 = vmul.f32 0.03125, %v1364_v26  ;;  %v1703_v26 = vld [vmem:[%s5432_s3 + $0x1c8] sm:$0xff] }
 0x79b   :  { %v1365_v63 = vmul.f32 0.03125, %v1361_v25  ;;  %v1702_v25 = vld [vmem:[%s5432_s3 + $0x1c0] sm:$0xff] }
 0x79c   :  { %v1380_v44 = vmul.f32 %v1366_v28, %v1366_v28  ;;  %v1378_v47 = vsub.f32 %v4931_v62, %v1366_v28  ;;  %v3614_v28 = vld [vmem:[%s5431_s2 + $0x68] ss:$0 sm:$0xff] }
 0x79d   :  { %v1379_v4 = vmul.f32 %v1365_v63, %v1365_v63  ;;  %v1377_v38 = vsub.f32 %v4934_v3, %v1365_v63  ;;  %v4257_v63 = vpack.c.bf16 %v1701_v24, %v1700_v23 }
 0x79e   :  { %v1371_v27 = vpop.xlane.xlu1 %1370 }
 0x79f   :  { %v1375_v29 = vmul.f32 0.03125, %v1371_v27  ;;  %v4261_v27 = vpack.c.bf16 %v1703_v26, %v1702_v25  ;;  %4258 = vmatprep.subr.bf16.mxu0 %v4257_v63 }
 0x7a1   :  { %v1381_v30 = vsub.f32 %v1375_v29, %v1379_v4 }
 0x7a2   :  { %v1374_v31 = vpop.xlane.xlu1 %1373 }
 0x7a3   :  { %v1383_v32 = vadd.f32 1e-05, %v1381_v30  ;;  %v1376_v34 = vmul.f32 0.03125, %v1374_v31 }
 0x7a5   :  { %4555 = vrsqrt.f32 %v1383_v32  ;;  %v1382_v36 = vsub.f32 %v1376_v34, %v1380_v44 }
 0x7a7   :  { %v1384_v8 = vadd.f32 1e-05, %v1382_v36 }
 0x7a9   :  { %4557 = vrsqrt.f32 %v1384_v8 }
 0x7af   :  { %v4556_v39 = vpop.eup %4555 }
 0x7b0   :  { %v1387_v40 = vmul.f32 %v4556_v39, %v1377_v38 }
 0x7b2   :  { %v1392_v2 = vmul.f32 %v3607_v37, %v1387_v40 }
 0x7b3   :  { %v4558_v48 = vpop.eup %4557 }
 0x7b4   :  { %v1388_v50 = vmul.f32 %v4558_v48, %v1378_v47  ;;  %v1397_v51 = vadd.f32 %v3609_v9, %v1392_v2  ;;  %v3611_v48 = vld [vmem:[%s5431_s2 + $0x60] ss:$0 sm:$0xff] }
 0x7b6   :  { %3946 = vmatprep.mubr.msk.f32.mxu1 %vm36_vm0, %v1397_v51  ;;  %3957 = vmatprep.mubr.msk.f32.mxu0 %vm36_vm0, %v1397_v51  ;;  %v1393_v54 = vmul.f32 %v3608_v41, %v1388_v50 }
 0x7b8   :  { %v1398_v55 = vadd.f32 %v3610_v52, %v1393_v54 }
 0x7ba   :  { %3947 = vmatmul.mubr.msk.f32.vlgmr.msra.gmra.mrb[6].mxu1 %vm36_vm0, %v1398_v55  ;;  %3958 = vmatmul.mubr.msk.f32.vlgmr.msra.gmra.mrb[14].mxu0 %vm36_vm0, %v1398_v55 }
 0x7bb   :  { %4003 = vmatprep.mubr.msk.f32.mxu0 %vm36_vm0, %v4706_v0  ;;  %4228 = vmatpush3.bf16.msra.mxu1 %v4225_v58  ;;  %v4229_v0 = vpack.c.bf16 %v1596_v60, %v1595_v59 }
 0x7bc   :  { %4260 = vmatpush3.bf16.msra.mxu0 %v4257_v63 }
 0x7bd   :  { %4230 = vmatprep.subr.bf16.mxu1 %v4229_v0  ;;  %4262 = vmatprep.subr.bf16.mxu0 %v4261_v27 }
 0x7bf   :  { %4232 = vmatpush3.bf16.msra.mxu1 %v4229_v0  ;;  %v1696_v0 = vld [vmem:[%s5432_s3 + $0x190] sm:$0xff] }
 0x7c0   :  { %4234 = vmatprep.subr.bf16.mxu1 %v4233_v46  ;;  %4264 = vmatpush3.bf16.msra.mxu0 %v4261_v27  ;;  %v4265_v45 = vpack.c.bf16 %v1697_v61, %v1696_v0  ;;  %v3627_v61 = vld [vmem:[%s5430_s1 + $0x78] sm:$0xff] }
 0x7c2   :  { %4266 = vmatprep.subr.bf16.mxu0 %v4265_v45 }
 0x7c3   :  { %4236 = vmatpush3.bf16.msra.mxu1 %v4233_v46  ;;  %4004 = vmatmul.mubr.msk.f32.vlgmr.msra.gmra.mrb[16].mxu0 %vm36_vm0, %v4711_v1  ;;  %v1698_v46 = vld [vmem:[%s5432_s3 + $0x1a0] sm:$0xff] }
 0x7c4   :  { %4238 = vmatprep.subr.bf16.mxu1 %v4237_v43  ;;  %4268 = vmatpush3.bf16.msra.mxu0 %v4265_v45  ;;  %v4269_v6 = vpack.c.bf16 %v1699_v5, %v1698_v46 }
 0x7c6   :  { %4270 = vmatprep.subr.bf16.mxu0 %v4269_v6 }
 0x7c7   :  { %4240 = vmatpush3.bf16.msra.mxu1 %v4237_v43  ;;  %v3617_v43 = vld [vmem:[%s5432_s3 + $0xa0] ss:$0 sm:$0xff] }
 0x7c8   :  { %4242 = vmatprep.subr.bf16.mxu1 %v4241_v14  ;;  %4272 = vmatpush3.bf16.msra.mxu0 %v4269_v6 }
 0x7cb   :  { %4244 = vmatpush3.bf16.msra.mxu1 %v4241_v14 }
 0x7cc   :  { %4246 = vmatprep.subr.bf16.mxu1 %v4245_v16 }
 0x7cf   :  { %4248 = vmatpush3.bf16.msra.mxu1 %v4245_v16 }
 0x7d0   :  { %4250 = vmatprep.subr.bf16.mxu1 %v4249_v19 }
 0x7d3   :  { %4252 = vmatpush3.bf16.msra.mxu1 %v4249_v19 }
 0x7d4   :  { %4254 = vmatprep.subr.bf16.mxu1 %v4253_v22 }
 0x7d7   :  { %4256 = vmatpush3.bf16.msra.mxu1 %v4253_v22 }
 0x88d   :  { %v3948_v4 = vpop.f32.mrb[6].mxu1  ;;  %v3959_v29 = vpop.f32.mrb[14].mxu0 }
 0x88e   :  { %v1570_v30 = vadd.f32 %v3959_v29, %v3614_v28  ;;  %v1480_v31 = vpop.f32.mrb[7].mxu1  ;;  %v1564_v44 = vpop.f32.mrb[15].mxu0  ;;  %v1486_v55 = vadd.f32 %v3948_v4, %v3611_v48  ;;  %v1909_v4 = vld [vmem:[%s5431_s2 + $0x78] sm:$0xff] }
 0x88f   :  { %v1565_v32 = vadd.f32 %v3614_v28, %v1564_v44  ;;  %v1481_v57 = vadd.f32 %v3611_v48, %v1480_v31  ;;  %v1908_v28 = vld [vmem:[%s5431_s2 + $0x70] sm:$0xff]  ;;  %v1911_v31 = vld [vmem:[%s5431_s2 + $0x88] sm:$0xff] }
 0x890   :  { %v1576_v34 = vmul.f32 0.044715, %v1570_v30  ;;  %v1574_v50 = vmul.f32 0.5, %v1570_v30  ;;  %v4273_v29 = vpack.c.bf16 %v1909_v4, %v1908_v28 }
 0x891   :  { %v1575_v36 = vmul.f32 0.044715, %v1565_v32  ;;  %v1573_v52 = vmul.f32 0.5, %v1565_v32 }
 0x892   :  { %v1578_v8 = vmul.f32 %v1576_v34, %v1570_v30  ;;  %4274 = vmatprep.subr.bf16.mxu0 %v4273_v29 }
 0x893   :  { %v1577_v38 = vmul.f32 %v1575_v36, %v1565_v32 }
 0x894   :  { %v1580_v39 = vmul.f32 %v1578_v8, %v1570_v30 }
 0x895   :  { %v1579_v37 = vmul.f32 %v1577_v38, %v1565_v32 }
 0x896   :  { %v1582_v40 = vadd.f32 %v1580_v39, %v1570_v30  ;;  %v1910_v30 = vld [vmem:[%s5431_s2 + $0x80] sm:$0xff] }
 0x897   :  { %v1581_v9 = vadd.f32 %v1579_v37, %v1565_v32  ;;  %v4277_v44 = vpack.c.bf16 %v1911_v31, %v1910_v30 }
 0x898   :  { %v1584_v47 = vmul.f32 0.7978846, %v1582_v40 }
 0x899   :  { %v1583_v1 = vmul.f32 0.7978846, %v1581_v9 }
 0x89a   :  { %4559 = vtanh.f32 %v1584_v47 }
 0x89b   :  { %4561 = vtanh.f32 %v1583_v1 }
 0x8a4   :  { %v4560_v2 = vpop.eup %4559 }
 0x8a5   :  { %v4562_v41 = vpop.eup %4561  ;;  %v1588_v51 = vadd.f32 1.0, %v4560_v2 }
 0x8a6   :  { %v1587_v54 = vadd.f32 1.0, %v4562_v41 }
 0x8a7   :  { %v1590_v56 = vmul.f32 %v1588_v51, %v1574_v50 }
 0x8a8   :  { %v1589_v58 = vmul.f32 %v1587_v54, %v1573_v52  ;;  %v3625_v54 = vld [vmem:[%s5430_s1 + $0x68] sm:$0xff] }
 0x8a9   :  { %v1592_v59 = vmul.f32 %v1590_v56, %v1486_v55 }
 0x8aa   :  { %v1591_v60 = vmul.f32 %v1589_v58, %v1481_v57  ;;  %v3624_v57 = vld [vmem:[%s5430_s1 + $0x60] sm:$0xff] }
 0x8ac   :  { %3992 = vmatprep.mubr.f32.mxu1 %v1591_v60 }
 0x8ad   :  { %3993 = vmatmul.mubr.f32.vlgmr.msra.gmra.mrb[8].mxu1 %v1592_v59  ;;  %v3626_v59 = vld [vmem:[%s5430_s1 + $0x70] sm:$0xff] }
 0x980   :  { %v3994_v42 = vpop.f32.mrb[8].mxu1 }
 0x981   :  { %v1686_v13 = vadd.f32 %v3994_v42, %v3617_v43  ;;  %v1680_v14 = vpop.f32.mrb[9].mxu1 }
 0x982   :  { %v1681_v16 = vadd.f32 %v3617_v43, %v1680_v14 }
 0x983   :  { %v1693_v17 = vmul.f32 %v3619_v7, %v1686_v13 }
 0x984   :  { %v1692_v18 = vmul.f32 %v3618_v15, %v1681_v16 }
 0x985   :  { %v1695_v20 = vadd.f32 %v1693_v17, %v4931_v62 }
 0x986   :  { %v1694_v19 = vadd.f32 %v1692_v18, %v4934_v3 }
 0x988   :  { %4014 = vmatprep.mubr.msk.f32.mxu0 %vm36_vm0, %v1694_v19 }
 0x989   :  { %4015 = vmatmul.mubr.msk.f32.vlgmr.msra.gmra.mrb[16].mxu0 %vm36_vm0, %v1695_v20 }
 0x98a   :  { %4276 = vmatpush3.bf16.msra.mxu0 %v4273_v29 }
 0x98b   :  { %4278 = vmatprep.subr.bf16.mxu0 %v4277_v44 }
 0x98e   :  { %4280 = vmatpush3.bf16.msra.mxu0 %v4277_v44 }
 0xa5c   :  { %v4016_v21 = vpop.f32.mrb[16].mxu0 }
 0xa5d   :  { %v5083_v22 = vadd.f32 %v4016_v21, %v1695_v20  ;;  %v1857_v23 = vpop.f32.mrb[17].mxu0 }
 0xa5e   :  { %v5085_v24 = vadd.f32 %v1857_v23, %v1694_v19 }
 0xa5f   :  { %v1871_v25 = vsel %vm36_vm0, %v5083_v22, 0.0  ;;  %v1877_v63 = vmul.f32 %v5083_v22, %v5083_v22 }
 0xa60   :  { %1872 = vadd.xlane.f32.xlu0 %v1871_v25  ;;  %v1868_v62 = vsel %vm36_vm0, %v5085_v24, 0.0  ;;  %v1876_v3 = vmul.f32 %v5085_v24, %v5085_v24 }
 0xa61   :  { %1869 = vadd.xlane.f32.xlu1 %v1868_v62  ;;  %v1881_v26 = vsel %vm36_vm0, %v1877_v63, 0.0 }
 0xa62   :  { %v1878_v27 = vsel %vm36_vm0, %v1876_v3, 0.0 }
 0xa64   :  { %1882 = vadd.xlane.f32.xlu0 %v1881_v26 }
 0xa65   :  { %1879 = vadd.xlane.f32.xlu1 %v1878_v27 }
 0xaed   :  { %v1873_v32 = vpop.xlane.xlu0 %1872 }
 0xaee   :  { %v1875_v34 = vmul.f32 0.03125, %v1873_v32  ;;  %v1870_v36 = vpop.xlane.xlu1 %1869 }
 0xaef   :  { %v1874_v8 = vmul.f32 0.03125, %v1870_v36 }
 0xaf0   :  { %v1889_v39 = vmul.f32 %v1875_v34, %v1875_v34  ;;  %v1887_v50 = vsub.f32 %v5083_v22, %v1875_v34 }
 0xaf1   :  { %v1883_v38 = vpop.xlane.xlu0 %1882  ;;  %v1888_v9 = vmul.f32 %v1874_v8, %v1874_v8  ;;  %v1886_v52 = vsub.f32 %v5085_v24, %v1874_v8 }
 0xaf2   :  { %v1885_v37 = vmul.f32 0.03125, %v1883_v38  ;;  %v1880_v40 = vpop.xlane.xlu1 %1879 }
 0xaf3   :  { %v1884_v47 = vmul.f32 0.03125, %v1880_v40 }
 0xaf4   :  { %v1891_v1 = vsub.f32 %v1885_v37, %v1889_v39 }
 0xaf5   :  { %v1890_v2 = vsub.f32 %v1884_v47, %v1888_v9 }
 0xaf6   :  { %v1893_v48 = vadd.f32 1e-05, %v1891_v1 }
 0xaf7   :  { %v1892_v41 = vadd.f32 1e-05, %v1890_v2 }
 0xaf8   :  { %4563 = vrsqrt.f32 %v1893_v48 }
 0xaf9   :  { %4565 = vrsqrt.f32 %v1892_v41 }
 0xb02   :  { %v4564_v51 = vpop.eup %4563 }
 0xb03   :  { %v4566_v55 = vpop.eup %4565  ;;  %v1897_v56 = vmul.f32 %v4564_v51, %v1887_v50 }
 0xb04   :  { %v1896_v58 = vmul.f32 %v4566_v55, %v1886_v52 }
 0xb05   :  { %v1902_v60 = vmul.f32 %v3625_v54, %v1897_v56 }
 0xb06   :  { %v1901_v0 = vmul.f32 %v3624_v57, %v1896_v58 }
 0xb07   :  { %v1907_v46 = vadd.f32 %v3627_v61, %v1902_v60 }
 0xb08   :  { %v1906_v45 = vadd.f32 %v3626_v59, %v1901_v0 }
 0xb0a   :  { %4025 = vmatprep.mubr.msk.f32.mxu0 %vm36_vm0, %v1906_v45 }
 0xb0b   :  { %4026 = vmatmul.mubr.msk.f32.vlgmr.msra.gmra.mrb[18].mxu0 %vm36_vm0, %v1907_v46 }
 0xbde   :  { %v5125_v5 = vpop.f32.mrb[18].mxu0 }
 0xbdf   :  { %v5127_v6 = vpop.f32.mrb[19].mxu0  ;;  %v5147_v7 = vmul.f32 0.35355338, %v5125_v5  ;;  %v3631_v55 = vmul.f32 -1.442695, %v5125_v5 }
 0xbe0   :  { %v5131_v43 = vpack.i.bf16 %v5125_v5, %v5127_v6  ;;  %v5134_v42 = vmul.f32 0.35355338, %v5127_v6  ;;  %v3630_v45 = vmul.f32 -1.442695, %v5127_v6 }
 0xbe2   :  { %4454 = vrot.lane.b32.xlu0 %v5131_v43, %s4659_s8  ;;  %4449 = vrot.lane.b32.xlu1 %v5131_v43, %s4660_s9 }
 0xbe3   :  { %4032 = vmatprep.mubr.msk.f32.mxu0 %vm186_vm1, %v5134_v42 }
 0xbe6   :  { %2595 = vrot.lane.b32.xlu0 %v5134_v42, %s4663_s12  ;;  %2223 = vrot.lane.b32.xlu1 %v5134_v42, %s4662_s11 }
 0xbea   :  { %2225 = vrot.lane.b32.xlu1 %v5147_v7, %s4662_s11 }
 0xbee   :  { %4459 = vrot.lane.b32.xlu1 %v5131_v43, %s4661_s10 }
 0xbf2   :  { %2597 = vrot.lane.b32.xlu1 %v5147_v7, %s4663_s12 }
 0xc54   :  { %v4455_v13 = vpop.permute.xlu0 %4454  ;;  %v4450_v14 = vpop.permute.xlu1 %4449 }
 0xc55   :  { %v4457_v15 = vunpack.i.h.bf16 %v4455_v13  ;;  %v4456_v16 = vunpack.i.l.bf16 %v4455_v13  ;;  %v4452_v17 = vunpack.i.h.bf16 %v4450_v14  ;;  %v4451_v18 = vunpack.i.l.bf16 %v4450_v14 }
 0xc57   :  { %v4291_v19 = vpack.c.bf16 %v4457_v15, %v4456_v16  ;;  %v4281_v20 = vpack.c.bf16 %v4452_v17, %v4451_v18 }
 0xc58   :  { %v2224_v21 = vpop.permute.xlu1 %2223  ;;  %v2596_v3 = vpop.permute.xlu0 %2595 }
 0xc59   :  { %4283 = vmatprep.subr.msk.bf16.mxu0 %vm4783_vm2, %v4281_v20  ;;  %4293 = vmatprep.subr.msk.bf16.mxu1 %vm4783_vm2, %v4291_v19 }
 0xc5a   :  { %4046 = vmatprep.mubr.msk.f32.mxu1 %vm186_vm1, %v2224_v21  ;;  %4286 = vmatpush3.bf16.xpose.msk.msra.mxu0 %vm4783_vm2, %v4281_v20 }
 0xc5b   :  { %4296 = vmatpush3.bf16.xpose.msk.msra.mxu1 %vm4783_vm2, %v4291_v19 }
 0xc5c   :  { %v2226_v23 = vpop.permute.xlu1 %2225 }
 0xc60   :  { %v4460_v25 = vpop.permute.xlu1 %4459 }
 0xc61   :  { %v4462_v63 = vunpack.i.h.bf16 %v4460_v25  ;;  %v4461_v62 = vunpack.i.l.bf16 %v4460_v25  ;;  %4033 = vmatmul.mubr.msk.f32.vlgmr.msra.gmra.mrb[20].mxu0 %vm186_vm1, %v5147_v7 }
 0xc62   :  { %4047 = vmatmul.mubr.msk.f32.vlgmr.msra.gmra.mrb[10].mxu1 %vm186_vm1, %v2226_v23 }
 0xc63   :  { %v4301_v26 = vpack.c.bf16 %v4462_v63, %v4461_v62  ;;  %4070 = vmatprep.mubr.msk.f32.mxu1 %vm186_vm1, %v2596_v3 }
 0xc64   :  { %v2598_v27 = vpop.permute.xlu1 %2597 }
 0xc65   :  { %4303 = vmatprep.subr.msk.bf16.mxu1 %vm4783_vm2, %v4301_v26 }
 0xc66   :  { %4306 = vmatpush3.bf16.xpose.msk.msra.mxu1 %vm4783_vm2, %v4301_v26 }
 0xc6d   :  { %4071 = vmatmul.mubr.msk.f32.vlgmr.msra.gmra.mrb[12].mxu1 %vm186_vm1, %v2598_v27 }
 0xd34   :  { %v4034_v28 = vpop.f32.mrb[20].mxu0 }
 0xd35   :  { %v2103_v4 = vmul.f32 0.02, %v4034_v28  ;;  %v4048_v29 = vpop.f32.mrb[10].mxu1  ;;  %v2093_v30 = vpop.f32.mrb[21].mxu0 }
 0xd36   :  { %v2315_v31 = vmul.f32 0.02, %v4048_v29  ;;  %v2102_v44 = vmul.f32 0.02, %v2093_v30  ;;  %v2305_v32 = vpop.f32.mrb[11].mxu1 }
 0xd37   :  { %4567 = vtanh.f32 %v2103_v4  ;;  %v2314_v34 = vmul.f32 0.02, %v2305_v32 }
 0xd38   :  { %4569 = vtanh.f32 %v2315_v31 }
 0xd39   :  { %4571 = vtanh.f32 %v2102_v44 }
 0xd3a   :  { %4573 = vtanh.f32 %v2314_v34 }
 0xd40   :  { %v4072_v36 = vpop.f32.mrb[12].mxu1 }
 0xd41   :  { %v4568_v8 = vpop.eup %4567  ;;  %v2677_v38 = vpop.f32.mrb[13].mxu1  ;;  %v2687_v17 = vmul.f32 0.02, %v4072_v36 }
 0xd42   :  { %v4570_v39 = vpop.eup %4569  ;;  %v2107_v37 = vmul.f32 50.0, %v4568_v8  ;;  %v2686_v19 = vmul.f32 0.02, %v2677_v38 }
 0xd43   :  { %v4572_v40 = vpop.eup %4571  ;;  %v2319_v9 = vmul.f32 50.0, %v4570_v39 }
 0xd44   :  { %v4574_v47 = vpop.eup %4573  ;;  %v2110_v1 = vmul.f32 1.442695, %v2107_v37  ;;  %v2106_v2 = vmul.f32 50.0, %v4572_v40 }
 0xd45   :  { %v2322_v48 = vmul.f32 1.442695, %v2319_v9  ;;  %v2318_v41 = vmul.f32 50.0, %v4574_v47 }
 0xd46   :  { %4575 = vpow2.f32 %v2110_v1  ;;  %v2108_v50 = vmul.f32 1.442695, %v2106_v2 }
 0xd47   :  { %4577 = vpow2.f32 %v2322_v48  ;;  %v2320_v51 = vmul.f32 1.442695, %v2318_v41 }
 0xd48   :  { %4579 = vpow2.f32 %v2108_v50 }
 0xd49   :  { %4581 = vpow2.f32 %v2320_v51 }
 0xd4a   :  { %4583 = vpow2.f32 %v3631_v55 }
 0xd4b   :  { %4585 = vpow2.f32 %v3630_v45 }
 0xd50   :  { %v4576_v52 = vpop.eup %4575 }
 0xd51   :  { %v4578_v54 = vpop.eup %4577  ;;  %v5175_v56 = vmul.f32 %v4576_v52, %v4812_v33 }
 0xd52   :  { %v4580_v57 = vpop.eup %4579  ;;  %v5178_v58 = vmul.f32 %v4578_v54, %v4812_v33 }
 0xd53   :  { %v2117_v59 = vsel %vm284_vm9, %v5175_v56, 0.0  ;;  %v5185_v0 = vmul.f32 %v4580_v57, %v4814_v35  ;;  %v4582_v61 = vpop.eup %4581  ;;  %v2005_v57 = vld [vmem:[%s5432_s3 + $0xe8] sm:$0xff] }
 0xd54   :  { %v2329_v60 = vsel %vm284_vm9, %v5178_v58, 0.0  ;;  %2118 = vadd.xlane.f32.xlu1 %v2117_v59  ;;  %v5191_v5 = vmul.f32 %v4582_v61, %v4814_v35  ;;  %v4584_v14 = vpop.eup %4583 }
 0xd55   :  { %2330 = vadd.xlane.f32.xlu0 %v2329_v60  ;;  %v2114_v46 = vsel %vm284_vm9, %v5185_v0, 0.0  ;;  %v2000_v15 = vadd.f32 1.0, %v4584_v14  ;;  %v4586_v16 = vpop.eup %4585 }
 0xd56   :  { %v2326_v13 = vsel %vm284_vm9, %v5191_v5, 0.0  ;;  %v1999_v6 = vadd.f32 1.0, %v4586_v16 }
 0xd57   :  { %4587 = vrcp.f32 %v2000_v15 }
 0xd58   :  { %4589 = vrcp.f32 %v1999_v6 }
 0xd59   :  { %2115 = vadd.xlane.f32.xlu0 %v2114_v46  ;;  %4591 = vtanh.f32 %v2687_v17 }
 0xd5a   :  { %4593 = vtanh.f32 %v2686_v19 }
 0xd5d   :  { %2327 = vadd.xlane.f32.xlu0 %v2326_v13 }
 0xd61   :  { %v5201_v18 = vpop.eup %4587 }
 0xd62   :  { %v5206_v20 = vpop.eup %4589 }
 0xd65   :  { %4469 = vrot.lane.b32.xlu1 %v5131_v43, %s4669_s16 }
 0xd69   :  { %4474 = vrot.lane.b32.xlu1 %v5131_v43, %s4667_s14 }
 0xd6d   :  { %2888 = vrot.lane.b32.xlu1 %v5134_v42, %s4668_s15  ;;  %v4592_v42 = vpop.eup %4591 }
 0xd6e   :  { %v2691_v21 = vmul.f32 50.0, %v4592_v42  ;;  %v4594_v25 = vpop.eup %4593 }
 0xd6f   :  { %v2690_v63 = vmul.f32 50.0, %v4594_v25 }
 0xd70   :  { %v2694_v23 = vmul.f32 1.442695, %v2691_v21 }
 0xd71   :  { %2428 = vperm.xlu1 %4479, %v5201_v18   ;;  %v2692_v62 = vmul.f32 1.442695, %v2690_v63 }
 0xd72   :  { %4595 = vpow2.f32 %v2694_v23 }
 0xd73   :  { %4464 = vrot.lane.b32.xlu0 %v5131_v43, %s4666_s13  ;;  %4597 = vpow2.f32 %v2692_v62 }
 0xd75   :  { %4480 = vset.pattern.permute.xlu1 %v4671_v11 }
 0xd76   :  { %2213 = vperm.xlu1 %4480, %v5206_v20  }
 0xd77   :  { %2890 = vrot.lane.b32.xlu0 %v5147_v7, %s4668_s15 }
 0xd7a   :  { %2218 = vperm.xlu1 %4480, %v5201_v18  }
 0xd7c   :  { %v4596_v3 = vpop.eup %4595 }
 0xd7d   :  { %v5215_v11 = vmul.f32 %v4596_v3, %v4812_v33  ;;  %v4598_v7 = vpop.eup %4597 }
 0xd7e   :  { %4486 = vset.pattern.permute.xlu1 %v4670_v10  ;;  %v5220_v27 = vmul.f32 %v4598_v7, %v4814_v35 }
 0xd7f   :  { %v2701_v26 = vsel %vm284_vm9, %v5215_v11, 0.0 }
 0xd80   :  { %v2698_v28 = vsel %vm284_vm9, %v5220_v27, 0.0 }
 0xd96   :  { %2702 = vadd.xlane.f32.xlu0 %v2701_v26 }
 0xd9e   :  { %2699 = vadd.xlane.f32.xlu1 %v2698_v28 }
 0xdac   :  { %2424 = vperm.xlu0 %4478, %v5206_v20  }
 0xdaf   :  { %4482 = vrot.lane.b32.xlu1 %v5131_v43, %s4672_s17 }
 0xdb0   :  { %4487 = vset.pattern.permute.xlu0 %v4670_v10 }
 0xdb3   :  { %2796 = vperm.xlu1 %4486, %v5206_v20  }
 0xdb7   :  { %4493 = vset.pattern.permute.xlu1 %v4673_v49 }
 0xde1   :  { %v2119_v4 = vpop.xlane.xlu1 %2118 }
 0xde2   :  { %v2331_v29 = vpop.xlane.xlu0 %2330 }
 0xde5   :  { %v4470_v30 = vpop.permute.xlu1 %4469 }
 0xde6   :  { %v2116_v31 = vpop.xlane.xlu0 %2115  ;;  %v4472_v10 = vunpack.i.h.bf16 %v4470_v30  ;;  %v4471_v37 = vunpack.i.l.bf16 %v4470_v30 }
 0xde7   :  { %4599 = vrcp.f32 %v2116_v31 }
 0xde8   :  { %4601 = vrcp.f32 %v2119_v4  ;;  %v4297_v41 = vpack.c.bf16 %v4472_v10, %v4471_v37 }
 0xde9   :  { %v4475_v44 = vpop.permute.xlu1 %4474 }
 0xdea   :  { %v4477_v32 = vunpack.i.h.bf16 %v4475_v44  ;;  %v4476_v34 = vunpack.i.l.bf16 %v4475_v44  ;;  %v2328_v36 = vpop.xlane.xlu0 %2327 }
 0xdeb   :  { %4603 = vrcp.f32 %v2328_v36 }
 0xdec   :  { %4605 = vrcp.f32 %v2331_v29  ;;  %v4311_v8 = vpack.c.bf16 %v4477_v32, %v4476_v34 }
 0xded   :  { %v2889_v38 = vpop.permute.xlu1 %2888 }
 0xdee   :  { %v4465_v39 = vpop.permute.xlu0 %4464  ;;  %4313 = vmatprep.subr.msk.bf16.mxu1 %vm4783_vm2, %v4311_v8  ;;  %4089 = vmatprep.mubr.msk.f32.mxu1 %vm186_vm1, %v2889_v38 }
 0xdef   :  { %v4467_v40 = vunpack.i.h.bf16 %v4465_v39  ;;  %v4466_v9 = vunpack.i.l.bf16 %v4465_v39  ;;  %4316 = vmatpush3.bf16.xpose.msk.msra.mxu1 %vm4783_vm2, %v4311_v8 }
 0xdf1   :  { %v4600_v47 = vpop.eup %4599  ;;  %v4287_v1 = vpack.c.bf16 %v4467_v40, %v4466_v9  ;;  %v2429_v59 = vpop.permute.xlu1 %2428 }
 0xdf2   :  { %v4602_v2 = vpop.eup %4601  ;;  %v2122_v48 = vmul.f32 %v4600_v47, %v5185_v0  ;;  %v2891_v52 = vpop.permute.xlu0 %2890 }
 0xdf3   :  { %4288 = vmatprep.subr.bf16.mxu0 %v4287_v1  ;;  %v2123_v51 = vmul.f32 %v4602_v2, %v5175_v56  ;;  %v2006_v56 = vld [vmem:[%s5432_s3 + $0xf0] sm:$0xff] }
 0xdf4   :  { %4290 = vmatpush3.bf16.msra.mxu0 %v4287_v1  ;;  %4039 = vmatprep.mubr.msk.f32.mxu0 %vm284_vm9, %v2122_v48 }
 0xdf5   :  { %v4604_v50 = vpop.eup %4603  ;;  %4298 = vmatprep.subr.bf16.mxu0 %v4297_v41  ;;  %v2214_v60 = vpop.permute.xlu1 %2213 }
 0xdf6   :  { %v4606_v54 = vpop.eup %4605  ;;  %4090 = vmatmul.mubr.msk.f32.vlgmr.msra.gmra.mrb[14].mxu1 %vm186_vm1, %v2891_v52  ;;  %v2334_v53 = vmul.f32 %v4604_v50, %v5191_v5  ;;  %v2008_v52 = vld [vmem:[%s5432_s3 + $0x100] sm:$0xff] }
 0xdf7   :  { %4040 = vmatmul.mubr.msk.f32.vlgmr.msra.gmra.mrb[22].mxu0 %vm284_vm9, %v2123_v51  ;;  %v2335_v55 = vmul.f32 %v4606_v54, %v5178_v58 }
 0xdf8   :  { %4300 = vmatpush3.bf16.msra.mxu0 %v4297_v41  ;;  %4053 = vmatprep.mubr.msk.f32.mxu0 %vm284_vm9, %v2334_v53 }
 0xdf9   :  { %4056 = vmatprep.subr.mxu0 %v2006_v56  ;;  %v2219_v0 = vpop.permute.xlu1 %2218 }
 0xdfb   :  { %4054 = vmatmul.mubr.msk.f32.vlgmr.msra.gmra.mrb[24].mxu0 %vm284_vm9, %v2335_v55 }
 0xdfc   :  { %4057 = vmatpush3.msra.mxu0 %v2006_v56 }
 0xdfd   :  { %4061 = vmatprep.subr.mxu0 %v2005_v57 }
 0xe23   :  { %v2703_v13 = vpop.xlane.xlu0 %2702 }
 0xe2b   :  { %v2700_v61 = vpop.xlane.xlu1 %2699  ;;  %v2425_v17 = vpop.permute.xlu0 %2424 }
 0xe2c   :  { %4607 = vrcp.f32 %v2700_v61 }
 0xe2f   :  { %v4483_v16 = vpop.permute.xlu1 %4482 }
 0xe30   :  { %v4485_v19 = vunpack.i.h.bf16 %v4483_v16  ;;  %v4484_v42 = vunpack.i.l.bf16 %v4483_v16 }
 0xe32   :  { %v4307_v62 = vpack.c.bf16 %v4485_v19, %v4484_v42  ;;  %v3229_v19 = vld [vmem:[%s5431_s2 + $0x98] sm:$0xff]  ;;  %v3318_v42 = vld [vmem:[%s5431_s2 + $0xb0] sm:$0xff] }
 0xe36   :  { %v4608_v3 = vpop.eup %4607 }
 0xe37   :  { %v2706_v32 = vmul.f32 %v4608_v3, %v5220_v27 }
 0xec9   :  { %v4091_v45 = vpop.f32.mrb[14].mxu1 }
 0xeca   :  { %v4041_v46 = vpop.f32.mrb[22].mxu0  ;;  %v2980_v58 = vmul.f32 0.02, %v4091_v45  ;;  %v2970_v5 = vpop.f32.mrb[15].mxu1 }
 0xecb   :  { %v2202_v14 = vpop.f32.mrb[23].mxu0  ;;  %v2979_v15 = vmul.f32 0.02, %v2970_v5  ;;  %v2222_v29 = vmul.f32 %v4041_v46, %v2219_v0  ;;  %v3664_v0 = vld [vmem:[%s5430_s1 + $0x80] sm:$0xff] }
 0xecc   :  { %4609 = vtanh.f32 %v2980_v58  ;;  %v2221_v63 = vmul.f32 %v2214_v60, %v2202_v14  ;;  %v3665_v60 = vld [vmem:[%s5430_s1 + $0x88] sm:$0xff] }
 0xecd   :  { %4611 = vtanh.f32 %v2979_v15 }
 0xece   :  { %v4055_v6 = vpop.f32.mrb[24].mxu0  ;;  %4613 = vrcp.f32 %v2703_v13 }
 0xecf   :  { %v2414_v21 = vpop.f32.mrb[25].mxu0  ;;  %v2432_v25 = vmul.f32 %v4055_v6, %v2429_v59 }
 0xed0   :  { %v2431_v23 = vmul.f32 %v2425_v17, %v2414_v21  ;;  %v3228_v17 = vld [vmem:[%s5431_s2 + $0x90] sm:$0xff] }
 0xed1   :  { %v4321_v21 = vpack.c.bf16 %v3229_v19, %v3228_v17  ;;  %v3436_v17 = vld [vmem:[%s5432_s3 + $0x178] sm:$0xff]  ;;  %v3437_v19 = vld [vmem:[%s5432_s3 + $0x180] sm:$0xff] }
 0xed2   :  { %4058 = vmatprep.mubr.msk.f32.mxu0 %vm186_vm1, %v2431_v23  ;;  %v3319_v23 = vld [vmem:[%s5431_s2 + $0xb8] sm:$0xff] }
 0xed3   :  { %4059 = vmatmul.mubr.msk.f32.vlgmr.msra.gmra.mrb[26].mxu0 %vm186_vm1, %v2432_v25  ;;  %v4329_v25 = vpack.c.bf16 %v3319_v23, %v3318_v42  ;;  %4322 = vmatprep.subr.bf16.mxu1 %v4321_v21  ;;  %v4365_v42 = vpack.c.bf16 %v3437_v19, %v3436_v17 }
 0xed4   :  { %4062 = vmatpush3.msra.mxu0 %v2005_v57  ;;  %4063 = vmatprep.mubr.msk.f32.mxu0 %vm186_vm1, %v2221_v63  ;;  %v3230_v63 = vld [vmem:[%s5431_s2 + $0xa0] sm:$0xff] }
 0xed5   :  { %4308 = vmatprep.subr.bf16.mxu0 %v4307_v62  ;;  %4324 = vmatpush3.bf16.msra.mxu1 %v4321_v21  ;;  %v3673_v21 = vld [vmem:[%s5431_s2 + $0xd8] ss:$0 sm:$0xff] }
 0xed6   :  { %v4610_v26 = vpop.eup %4609 }
 0xed7   :  { %v4612_v7 = vpop.eup %4611  ;;  %v2984_v28 = vmul.f32 50.0, %v4610_v26  ;;  %v3320_v26 = vld [vmem:[%s5431_s2 + $0xc0] sm:$0xff] }
 0xed8   :  { %v2983_v4 = vmul.f32 50.0, %v4612_v7  ;;  %v4614_v31 = vpop.eup %4613  ;;  %v3321_v7 = vld [vmem:[%s5431_s2 + $0xc8] sm:$0xff] }
 0xed9   :  { %v2987_v30 = vmul.f32 1.442695, %v2984_v28  ;;  %v2707_v34 = vmul.f32 %v4614_v31, %v5215_v11  ;;  %v2007_v11 = vld [vmem:[%s5432_s3 + $0xf8] sm:$0xff]  ;;  %v4333_v28 = vpack.c.bf16 %v3321_v7, %v3320_v26 }
 0xeda   :  { %v2985_v44 = vmul.f32 1.442695, %v2983_v4 }
 0xedb   :  { %4615 = vpow2.f32 %v2987_v30  ;;  %4064 = vmatmul.mubr.msk.f32.vlgmr.msra.gmra.mrb[26].mxu0 %vm186_vm1, %v2222_v29 }
 0xedc   :  { %4617 = vpow2.f32 %v2985_v44  ;;  %4310 = vmatpush3.bf16.msra.mxu0 %v4307_v62  ;;  %4077 = vmatprep.mubr.msk.f32.mxu0 %vm284_vm9, %v2706_v32  ;;  %v3231_v62 = vld [vmem:[%s5431_s2 + $0xa8] sm:$0xff] }
 0xedd   :  { %4080 = vmatprep.subr.mxu0 %v2007_v11  ;;  %v4325_v3 = vpack.c.bf16 %v3231_v62, %v3230_v63 }
 0xedf   :  { %4078 = vmatmul.mubr.msk.f32.vlgmr.msra.gmra.mrb[28].mxu0 %vm284_vm9, %v2707_v34  ;;  %4326 = vmatprep.subr.bf16.mxu1 %v4325_v3 }
 0xee0   :  { %4081 = vmatpush3.msra.mxu0 %v2007_v11  ;;  %4328 = vmatpush3.bf16.msra.mxu1 %v4325_v3 }
 0xee5   :  { %v4616_v36 = vpop.eup %4615 }
 0xee6   :  { %v4618_v8 = vpop.eup %4617  ;;  %v2990_v38 = vmul.f32 %v4616_v36, %v4812_v33  ;;  %v2797_v33 = vpop.permute.xlu1 %2796 }
 0xee7   :  { %v2989_v39 = vmul.f32 %v4618_v8, %v4814_v35 }
 0xee8   :  { %v2994_v10 = vsel %vm284_vm9, %v2990_v38, 0.0 }
 0xee9   :  { %2995 = vadd.xlane.f32.xlu0 %v2994_v10  ;;  %v2991_v27 = vsel %vm284_vm9, %v2989_v39, 0.0 }
 0xeea   :  { %2992 = vadd.xlane.f32.xlu1 %v2991_v27 }
 0xefb   :  { %4489 = vrot.lane.b32.xlu1 %v5131_v43, %s4674_s21 }
 0xeff   :  { %3089 = vperm.xlu1 %4493, %v5206_v20   ;;  %2800 = vperm.xlu0 %4487, %v5201_v18  }
 0xf03   :  { %3093 = vperm.xlu1 %4493, %v5201_v18   ;;  %4494 = vset.pattern.permute.xlu0 %v4673_v49 }
 0xf76   :  { %v2996_v20 = vpop.xlane.xlu0 %2995 }
 0xf77   :  { %v2993_v35 = vpop.xlane.xlu1 %2992 }
 0xf78   :  { %4619 = vrcp.f32 %v2993_v35 }
 0xf79   :  { %4621 = vrcp.f32 %v2996_v20 }
 0xf7b   :  { %v4490_v37 = vpop.permute.xlu1 %4489 }
 0xf7c   :  { %v4492_v40 = vunpack.i.h.bf16 %v4490_v37  ;;  %v4491_v9 = vunpack.i.l.bf16 %v4490_v37  ;;  %v3666_v37 = vld [vmem:[%s5430_s1 + $0x90] sm:$0xff] }
 0xf7e   :  { %v4317_v43 = vpack.c.bf16 %v4492_v40, %v4491_v9  ;;  %v2801_v48 = vpop.permute.xlu0 %2800  ;;  %v3668_v9 = vld [vmem:[%s5430_s1 + $0xa0] sm:$0xff] }
 0xf7f   :  { %v3090_v54 = vpop.permute.xlu1 %3089 }
 0xf80   :  { %4318 = vmatprep.subr.bf16.mxu0 %v4317_v43 }
 0xf82   :  { %v4620_v1 = vpop.eup %4619 }
 0xf83   :  { %v4622_v51 = vpop.eup %4621  ;;  %v2999_v49 = vmul.f32 %v4620_v1, %v2989_v39  ;;  %v3094_v56 = vpop.permute.xlu1 %3093  ;;  %v3667_v1 = vld [vmem:[%s5430_s1 + $0x98] sm:$0xff] }
 0xf84   :  { %v3000_v18 = vmul.f32 %v4622_v51, %v2990_v38 }
 0xfb2   :  { %v4079_v47 = vpop.f32.mrb[28].mxu0 }
 0xfb3   :  { %v2786_v2 = vpop.f32.mrb[29].mxu0  ;;  %v2804_v50 = vmul.f32 %v4079_v47, %v2801_v48 }
 0xfb4   :  { %v2803_v41 = vmul.f32 %v2797_v33, %v2786_v2 }
 0xfb6   :  { %4082 = vmatprep.mubr.msk.f32.mxu0 %vm186_vm1, %v2803_v41  ;;  %v3669_v41 = vld [vmem:[%s5430_s1 + $0xa8] sm:$0xff] }
 0xfb7   :  { %4083 = vmatmul.mubr.msk.f32.vlgmr.msra.gmra.mrb[26].mxu0 %vm186_vm1, %v2804_v50 }
 0xfb8   :  { %4320 = vmatpush3.bf16.msra.mxu0 %v4317_v43  ;;  %4096 = vmatprep.mubr.msk.f32.mxu0 %vm284_vm9, %v2999_v49  ;;  %v3422_v49 = vld [vmem:[%s5432_s3 + $0x108] sm:$0xff] }
 0xfb9   :  { %4099 = vmatprep.subr.mxu0 %v2008_v52 }
 0xfbb   :  { %4097 = vmatmul.mubr.msk.f32.vlgmr.msra.gmra.mrb[30].mxu0 %vm284_vm9, %v3000_v18  ;;  %v3423_v18 = vld [vmem:[%s5432_s3 + $0x110] sm:$0xff] }
 0xfbc   :  { %4100 = vmatpush3.msra.mxu0 %v2008_v52  ;;  %v4337_v52 = vpack.c.bf16 %v3423_v18, %v3422_v49 }
 0xfbd   :  { %4330 = vmatprep.subr.bf16.mxu0 %v4329_v25 }
 0xfbe   :  { %4338 = vmatprep.subr.bf16.mxu1 %v4337_v52 }
0x108e   :  { %v4098_v53 = vpop.f32.mrb[30].mxu0 }
0x108f   :  { %v3079_v55 = vpop.f32.mrb[31].mxu0  ;;  %v3097_v59 = vmul.f32 %v4098_v53, %v3094_v56  ;;  %v3425_v53 = vld [vmem:[%s5432_s3 + $0x120] sm:$0xff]  ;;  %v3426_v56 = vld [vmem:[%s5432_s3 + $0x128] sm:$0xff] }
0x1090   :  { %v3096_v57 = vmul.f32 %v3090_v54, %v3079_v55  ;;  %v3424_v54 = vld [vmem:[%s5432_s3 + $0x118] sm:$0xff] }
0x1091   :  { %v4341_v55 = vpack.c.bf16 %v3425_v53, %v3424_v54 }
0x1092   :  { %4101 = vmatprep.mubr.msk.f32.mxu0 %vm186_vm1, %v3096_v57  ;;  %v3427_v57 = vld [vmem:[%s5432_s3 + $0x130] sm:$0xff] }
0x1093   :  { %4102 = vmatmul.mubr.msk.f32.vlgmr.msra.gmra.mrb[26].mxu0 %vm186_vm1, %v3097_v59  ;;  %v4345_v59 = vpack.c.bf16 %v3427_v57, %v3426_v56 }
0x1094   :  { %4332 = vmatpush3.bf16.msra.mxu0 %v4329_v25 }
0x1095   :  { %4334 = vmatprep.subr.bf16.mxu0 %v4333_v28 }
0x1098   :  { %4336 = vmatpush3.bf16.msra.mxu0 %v4333_v28 }
0x1166   :  { %v4103_v61 = vpop.f32.mrb[26].mxu0 }
0x1167   :  { %v3185_v45 = vmul.f32 %v4103_v61, %v3665_v60  ;;  %v3170_v46 = vpop.f32.mrb[27].mxu0  ;;  %v3428_v60 = vld [vmem:[%s5432_s3 + $0x138] sm:$0xff] }
0x1168   :  { %v3184_v58 = vmul.f32 %v3664_v0, %v3170_v46  ;;  %v3429_v0 = vld [vmem:[%s5432_s3 + $0x140] sm:$0xff]  ;;  %v3431_v46 = vld [vmem:[%s5432_s3 + $0x150] sm:$0xff] }
0x1169   :  { %v5287_v5 = vadd.f32 %v3185_v45, %v5083_v22  ;;  %v4349_v61 = vpack.c.bf16 %v3429_v0, %v3428_v60  ;;  %v3430_v45 = vld [vmem:[%s5432_s3 + $0x148] sm:$0xff] }
0x116a   :  { %v5290_v13 = vadd.f32 %v3184_v58, %v5085_v24  ;;  %v3432_v58 = vld [vmem:[%s5432_s3 + $0x158] sm:$0xff] }
0x116b   :  { %v3191_v14 = vsel %vm36_vm0, %v5287_v5, 0.0  ;;  %v3197_v22 = vmul.f32 %v5287_v5, %v5287_v5 }
0x116c   :  { %3192 = vadd.xlane.f32.xlu0 %v3191_v14  ;;  %v3188_v15 = vsel %vm36_vm0, %v5290_v13, 0.0  ;;  %v3196_v16 = vmul.f32 %v5290_v13, %v5290_v13  ;;  %v4353_v14 = vpack.c.bf16 %v3431_v46, %v3430_v45 }
0x116d   :  { %3189 = vadd.xlane.f32.xlu1 %v3188_v15  ;;  %v3201_v24 = vsel %vm36_vm0, %v3197_v22, 0.0  ;;  %v3433_v15 = vld [vmem:[%s5432_s3 + $0x160] sm:$0xff]  ;;  %v3435_v22 = vld [vmem:[%s5432_s3 + $0x170] sm:$0xff] }
0x116e   :  { %v3198_v6 = vsel %vm36_vm0, %v3196_v16, 0.0  ;;  %v4357_v16 = vpack.c.bf16 %v3433_v15, %v3432_v58 }
0x1171   :  { %3199 = vadd.xlane.f32.xlu1 %v3198_v6  ;;  %v3434_v6 = vld [vmem:[%s5432_s3 + $0x168] sm:$0xff] }
0x1175   :  { %3202 = vadd.xlane.f32.xlu1 %v3201_v24  ;;  %v4361_v24 = vpack.c.bf16 %v3435_v22, %v3434_v6 }
0x11f9   :  { %v3193_v30 = vpop.xlane.xlu0 %3192 }
0x11fa   :  { %v3190_v4 = vpop.xlane.xlu1 %3189  ;;  %v3195_v44 = vmul.f32 0.03125, %v3193_v30 }
0x11fb   :  { %v3194_v29 = vmul.f32 0.03125, %v3190_v4 }
0x11fc   :  { %v3209_v38 = vmul.f32 %v3195_v44, %v3195_v44  ;;  %v3207_v43 = vsub.f32 %v5287_v5, %v3195_v44 }
0x11fd   :  { %v3208_v32 = vmul.f32 %v3194_v29, %v3194_v29  ;;  %v3206_v33 = vsub.f32 %v5290_v13, %v3194_v29 }
0x11fe   :  { %v3200_v31 = vpop.xlane.xlu1 %3199 }
0x11ff   :  { %v3204_v34 = vmul.f32 0.03125, %v3200_v31 }
0x1201   :  { %v3210_v36 = vsub.f32 %v3204_v34, %v3208_v32 }
0x1202   :  { %v3203_v8 = vpop.xlane.xlu1 %3202 }
0x1203   :  { %v3212_v39 = vadd.f32 1e-05, %v3210_v36  ;;  %v3205_v10 = vmul.f32 0.03125, %v3203_v8 }
0x1205   :  { %4623 = vrsqrt.f32 %v3212_v39  ;;  %v3211_v27 = vsub.f32 %v3205_v10, %v3209_v38  ;;  %v3670_v38 = vld [vmem:[%s5431_s2 + $0xd0] ss:$0 sm:$0xff] }
0x1207   :  { %v3213_v11 = vadd.f32 1e-05, %v3211_v27 }
0x1209   :  { %4625 = vrsqrt.f32 %v3213_v11 }
0x120f   :  { %v4624_v35 = vpop.eup %4623 }
0x1210   :  { %v3216_v40 = vmul.f32 %v4624_v35, %v3206_v33 }
0x1212   :  { %v3221_v20 = vmul.f32 %v3666_v37, %v3216_v40 }
0x1213   :  { %v4626_v47 = vpop.eup %4625 }
0x1214   :  { %v3217_v2 = vmul.f32 %v4626_v47, %v3207_v43  ;;  %v3226_v48 = vadd.f32 %v3668_v9, %v3221_v20  ;;  %v3676_v47 = vld [vmem:[%s5432_s3 + $0x188] ss:$0 sm:$0xff] }
0x1216   :  { %4112 = vmatprep.mubr.msk.f32.mxu1 %vm36_vm0, %v3226_v48  ;;  %4123 = vmatprep.mubr.msk.f32.mxu0 %vm36_vm0, %v3226_v48  ;;  %v3222_v50 = vmul.f32 %v3667_v1, %v3217_v2  ;;  %v3678_v2 = vld [vmem:[%s5430_s1 + $0xb8] sm:$0xff] }
0x1218   :  { %v3227_v51 = vadd.f32 %v3669_v41, %v3222_v50  ;;  %v3677_v50 = vld [vmem:[%s5430_s1 + $0xb0] sm:$0xff] }
0x121a   :  { %4113 = vmatmul.mubr.msk.f32.vlgmr.msra.gmra.mrb[16].mxu1 %vm36_vm0, %v3227_v51  ;;  %4124 = vmatmul.mubr.msk.f32.vlgmr.msra.gmra.mrb[32].mxu0 %vm36_vm0, %v3227_v51 }
0x121b   :  { %4340 = vmatpush3.bf16.msra.mxu1 %v4337_v52 }
0x121c   :  { %4342 = vmatprep.subr.bf16.mxu1 %v4341_v55 }
0x121f   :  { %4344 = vmatpush3.bf16.msra.mxu1 %v4341_v55 }
0x1220   :  { %4346 = vmatprep.subr.bf16.mxu1 %v4345_v59 }
0x1223   :  { %4348 = vmatpush3.bf16.msra.mxu1 %v4345_v59 }
0x1224   :  { %4350 = vmatprep.subr.bf16.mxu1 %v4349_v61 }
0x1227   :  { %4352 = vmatpush3.bf16.msra.mxu1 %v4349_v61 }
0x1228   :  { %4354 = vmatprep.subr.bf16.mxu1 %v4353_v14 }
0x122b   :  { %4356 = vmatpush3.bf16.msra.mxu1 %v4353_v14 }
0x122c   :  { %4358 = vmatprep.subr.bf16.mxu1 %v4357_v16 }
0x122f   :  { %4360 = vmatpush3.bf16.msra.mxu1 %v4357_v16 }
0x1230   :  { %4362 = vmatprep.subr.bf16.mxu1 %v4361_v24 }
0x1233   :  { %4364 = vmatpush3.bf16.msra.mxu1 %v4361_v24 }
0x1234   :  { %4366 = vmatprep.subr.bf16.mxu1 %v4365_v42 }
0x1237   :  { %4368 = vmatpush3.bf16.msra.mxu1 %v4365_v42 }
0x12ed   :  { %v4114_v23 = vpop.f32.mrb[16].mxu1  ;;  %v4125_v25 = vpop.f32.mrb[32].mxu0 }
0x12ee   :  { %v3399_v63 = vadd.f32 %v4125_v25, %v3673_v21  ;;  %v3309_v62 = vpop.f32.mrb[17].mxu1  ;;  %v3393_v3 = vpop.f32.mrb[33].mxu0  ;;  %v3315_v35 = vadd.f32 %v4114_v23, %v3670_v38 }
0x12ef   :  { %v3394_v26 = vadd.f32 %v3673_v21, %v3393_v3  ;;  %v3310_v40 = vadd.f32 %v3670_v38, %v3309_v62 }
0x12f0   :  { %v3405_v7 = vmul.f32 0.044715, %v3399_v63  ;;  %v3403_v10 = vmul.f32 0.5, %v3399_v63 }
0x12f1   :  { %v3404_v28 = vmul.f32 0.044715, %v3394_v26  ;;  %v3402_v11 = vmul.f32 0.5, %v3394_v26 }
0x12f2   :  { %v3407_v4 = vmul.f32 %v3405_v7, %v3399_v63 }
0x12f3   :  { %v3406_v29 = vmul.f32 %v3404_v28, %v3394_v26 }
0x12f4   :  { %v3409_v30 = vmul.f32 %v3407_v4, %v3399_v63 }
0x12f5   :  { %v3408_v31 = vmul.f32 %v3406_v29, %v3394_v26 }
0x12f6   :  { %v3411_v44 = vadd.f32 %v3409_v30, %v3399_v63 }
0x12f7   :  { %v3410_v32 = vadd.f32 %v3408_v31, %v3394_v26 }
0x12f8   :  { %v3413_v34 = vmul.f32 0.7978846, %v3411_v44 }
0x12f9   :  { %v3412_v36 = vmul.f32 0.7978846, %v3410_v32 }
0x12fa   :  { %4627 = vtanh.f32 %v3413_v34 }
0x12fb   :  { %4629 = vtanh.f32 %v3412_v36 }
0x1304   :  { %v4628_v8 = vpop.eup %4627 }
0x1305   :  { %v4630_v39 = vpop.eup %4629  ;;  %v3417_v27 = vadd.f32 1.0, %v4628_v8 }
0x1306   :  { %v3416_v33 = vadd.f32 1.0, %v4630_v39 }
0x1307   :  { %v3419_v37 = vmul.f32 %v3417_v27, %v3403_v10 }
0x1308   :  { %v3418_v9 = vmul.f32 %v3416_v33, %v3402_v11 }
0x1309   :  { %v3421_v43 = vmul.f32 %v3419_v37, %v3315_v35 }
0x130a   :  { %v3420_v20 = vmul.f32 %v3418_v9, %v3310_v40 }
0x130c   :  { %4158 = vmatprep.mubr.f32.mxu1 %v3420_v20 }
0x130d   :  { %4159 = vmatmul.mubr.f32.vlgmr.msra.gmra.mrb[18].mxu1 %v3421_v43 }
0x13e0   :  { %v4160_v1 = vpop.f32.mrb[18].mxu1 }
0x13e1   :  { %v3515_v48 = vadd.f32 %v4160_v1, %v3676_v47  ;;  %v3509_v41 = vpop.f32.mrb[19].mxu1 }
0x13e2   :  { %v3510_v51 = vadd.f32 %v3676_v47, %v3509_v41 }
0x13e3   :  { %v3522_v49 = vmul.f32 %v3678_v2, %v3515_v48 }
0x13e4   :  { %v3521_v18 = vmul.f32 %v3677_v50, %v3510_v51 }
0x13e5   :  { %v3524_v52 = vadd.f32 %v3522_v49, %v5287_v5  ;;  %v3525_v5 = vld [vmem:[%s5432_s3 + $0x1d0] sm:$0x1]  ;;  %s4635_s3 = scalar_lea.vmem %s3557_s30, 256 }
0x13e6   :  { %v3523_v54 = vadd.f32 %v3521_v18, %v5290_v13  ;;  %v3542_v45 = vadd.f32 1.0, %v3525_v5  ;;  %v3545_v13 = vsub.s32 0, %v4807_v12  ;;  %p4636_p0 = scmp.ne.s32.totalorder %s3557_s30, %s4635_s3  ;;  %p4641_p2 = scmp.lt.s32.totalorder %s4635_s3, %s4635_s3 }
0x13e7   :  { %v3527_v56 = vmul.f32 %v3524_v52, %v3524_v52 }
0x13e8   :  { %v3526_v53 = vmul.f32 %v3523_v54, %v3523_v54  ;;  %v3546_v14 = vrot.slane %v3542_v45, %v3545_v13  ;;  %p4642_p3 = por %p4641_p2, %p4640_p1 }
0x13e9   :  { %v3531_v57 = vsel %vm36_vm0, %v3527_v56, 0.0 }
0x13ea   :  { %v3528_v55 = vsel %vm36_vm0, %v3526_v53, 0.0  ;;  %p4643_p4 = pnand %p4642_p3, %p4636_p0 }
0x13eb   :  { %3529 = vadd.xlane.f32.xlu1 %v3528_v55 }
0x13ef   :  { %3532 = vadd.xlane.f32.xlu1 %v3531_v57 }
0x1478   :  { %v3530_v59 = vpop.xlane.xlu1 %3529 }
0x1479   :  { %v3534_v60 = vmax.f32 %v3530_v59, 1e-24 }
0x147b   :  { %4631 = vrsqrt.f32 %v3534_v60 }
0x147c   :  { %v3533_v0 = vpop.xlane.xlu1 %3532 }
0x147d   :  { %v3535_v61 = vmax.f32 %v3533_v0, 1e-24 }
0x147f   :  { %4633 = vrsqrt.f32 %v3535_v61 }
0x1485   :  { %v4632_v46 = vpop.eup %4631 }
0x1486   :  { %v3538_v58 = vmul.f32 %v4632_v46, %v3523_v54 }
0x1488   :  { %v3540_v15 = vmul.f32 5.656854, %v3538_v58 }
0x1489   :  { %v4634_v16 = vpop.eup %4633 }
0x148a   :  { %v3539_v6 = vmul.f32 %v4634_v16, %v3524_v52  ;;  %v3547_v22 = vmul.f32 %v3546_v14, %v3540_v15 }
0x148c   :  { %v3541_v24 = vmul.f32 5.656854, %v3539_v6  ;;  %3549 = vst.msk [vmem:[#allocation2] sm:$0xff] %vm36_vm0, %v3547_v22 }
0x148e   :  { %v3548_v17 = vmul.f32 %v3546_v14, %v3541_v24 }
0x1490   :  { %3550 = vst.msk [vmem:[#allocation2 + $0x8] sm:$0xff] %vm36_vm0, %v3548_v17 }
0x1491   :  { %4646 = shalt.err (!%p4643_p4)
}
0x1492   :  { %s4647_s9 = scalar_lea.hbm %s5433_s4, 256 }
0x1493   :  { %p4648_p5 = scmp.ne.s32.totalorder %s5433_s4, %s4647_s9  ;;  %p4651_p6 = scmp.lt.u32.totalorder %s4647_s9, %s5433_s4 }
0x1495   :  { %p4653_p7 = pnand %p4651_p6, %p4648_p5 }
0x1497   :  { %4656 = shalt.err (!%p4653_p7)
}
0x1498   :  { %s4676_s14 = smov 128   ;;  %s4677_s15 = smov 8  }
0x1499   :  { %3562 = dma.vmem_to_hbm [thread:$0]  %s3557_s30, 256, %s5433_s4, [#allocation3], %s4676_s14, %s4676_s14, %s4677_s15  }
0x149a   :  { %4657 = dma.done.wait [#allocation3], 256  }
0x149b   :  { %4658 = vsyncadd [#allocation3], 4294967040 }
0x149c   :  { %3566 = vsyncpa [#allocation3], 1 }

</bundles_post_ra>
